<compile_context>
chip_gen: v7x
topology: tpu7x:2x2x1
jax: 0.10.0
libtpu: 0.0.40
codegen_flags: <defaults>
</compile_context>

<pallas_src>
import jax
import jax.numpy as jnp
from jax.experimental import pallas as pl
from jax.experimental.pallas import tpu as pltpu


COMPUTE_DTYPE = jnp.bfloat16   # matmul operand dtype (f32 accumulation)
C1_PAD = 8                     # conv1 out-channels padded 6 -> 8 (sublane-friendly)
TILE_B_CAP = 16                # conv batch tile cap; raise to ~32-48 (v7x) or
                               # ~64-96 (v5e/v6e, 128 MiB VMEM) for big batches


# ----------------------------- Pallas kernels ------------------------------

def _conv_pool_kernel(pat_ref, w_ref, b_ref, o_ref):
    """Fused 5x5 conv + bias + ReLU + 2x2 max-pool for a tile of images.

    pat_ref : (TB, M2, K6)  6x6/stride-2 im2col patches (one row per pooled pixel)
    w_ref   : (4, K6, C)    conv weights embedded at the 4 pool phases
    b_ref   : (1, C)        bias (float32)
    o_ref   : (TB, M2, C)   pooled activations
    """
    w00 = w_ref[0]
    w01 = w_ref[1]
    w10 = w_ref[2]
    w11 = w_ref[3]
    b = b_ref[...]

    def body(i, carry):
        p = pat_ref[i]                                                 # (M2, K6)
        m = jnp.dot(p, w00, preferred_element_type=jnp.float32)
        m = jnp.maximum(m, jnp.dot(p, w01, preferred_element_type=jnp.float32))
        m = jnp.maximum(m, jnp.dot(p, w10, preferred_element_type=jnp.float32))
        m = jnp.maximum(m, jnp.dot(p, w11, preferred_element_type=jnp.float32))
        # max over the pool window commutes with the shared bias add + ReLU.
        o_ref[i] = jnp.maximum(m + b, 0.0).astype(o_ref.dtype)
        return carry

    jax.lax.fori_loop(0, pat_ref.shape[0], body, 0)


def _fc_block_kernel(x_ref, w1_ref, b1_ref, w2_ref, b2_ref, w3_ref, b3_ref, o_ref):
    """Fused fc1+ReLU+fc2+ReLU+fc3 on a tile of rows.  Hidden dims are padded
    to 128 lanes; padded lanes stay exactly zero (zero weight cols / bias)."""
    h = jnp.dot(x_ref[...], w1_ref[...], preferred_element_type=jnp.float32)
    h = jnp.maximum(h + b1_ref[...], 0.0).astype(w2_ref.dtype)
    h = jnp.dot(h, w2_ref[...], preferred_element_type=jnp.float32)
    h = jnp.maximum(h + b2_ref[...], 0.0).astype(w3_ref.dtype)
    h = jnp.dot(h, w3_ref[...], preferred_element_type=jnp.float32) + b3_ref[...]
    o_ref[...] = h.astype(o_ref.dtype)


# ------------------------------ small helpers -------------------------------

def _round_up(n, m):
    return (n + m - 1) // m * m


def _pick_tile_b(batch, cap=TILE_B_CAP):
    """Largest divisor of `batch` <= cap, keeping >=2 grid steps when possible
    (v7x has 2 TensorCores; the grid axis is marked "parallel")."""
    limit = max(1, min(cap, batch // 2 if batch > 1 else 1))
    t = limit
    while batch % t:
        t -= 1
    return t


# ------------------------------ conv stage ----------------------------------

def conv_pool_stage(x_nhwc, w_stack, b_row):
    """maxpool2x2(relu(conv5x5_valid(x))) via one fused pallas_call.

    The 2x2 pool phases are folded into the 4 weight matrices of `w_stack`
    acting on a single 6x6/stride-2 patch tensor, so patch data is extracted
    and DMA'd exactly once."""
    B, H, W, Cin = x_nhwc.shape
    _, K6, Cout = w_stack.shape
    assert K6 == Cin * 36, (K6, Cin)
    OH2 = (H - 6) // 2 + 1
    OW2 = (W - 6) // 2 + 1
    M2 = OH2 * OW2

    # One im2col: feature order is (cin, kh, kw) with cin slowest, matching the
    # weight embedding in prepare_params.
    patches = jax.lax.conv_general_dilated_patches(
        x_nhwc, (6, 6), (2, 2), "VALID",
        dimension_numbers=("NHWC", "OIHW", "NHWC"))          # (B, OH2, OW2, K6)
    patches = patches.reshape(B, M2, K6)

    tile_b = _pick_tile_b(B)
    out = pl.pallas_call(
        _conv_pool_kernel,
        out_shape=jax.ShapeDtypeStruct((B, M2, Cout), x_nhwc.dtype),
        grid=(B // tile_b,),
        in_specs=[pl.BlockSpec((tile_b, M2, K6), lambda i: (i, 0, 0)),
                  pl.BlockSpec((4, K6, Cout), lambda i: (0, 0, 0)),
                  pl.BlockSpec((1, Cout), lambda i: (0, 0))],
        out_specs=pl.BlockSpec((tile_b, M2, Cout), lambda i: (i, 0, 0)),
        compiler_params=pltpu.CompilerParams(
            dimension_semantics=("parallel",)),
    )(patches, w_stack, b_row)
    return out.reshape(B, OH2, OW2, Cout)


# -------------------------------- FC stage ----------------------------------

def fc_block(x, w1p, b1p, w2p, b2p, w3p, b3p):
    """Fused FC stack with a row grid (TILE_M multiple of 8) so it scales to
    large batch without exhausting VMEM; weights stay resident."""
    B, F = x.shape
    n_out = w3p.shape[1]
    tile_m = min(256, _round_up(max(B, 1), 8))
    b_pad = _round_up(B, tile_m)
    if b_pad != B:
        x = jnp.pad(x, ((0, b_pad - B), (0, 0)))

    out = pl.pallas_call(
        _fc_block_kernel,
        out_shape=jax.ShapeDtypeStruct((b_pad, n_out), jnp.float32),
        grid=(b_pad // tile_m,),
        in_specs=[pl.BlockSpec((tile_m, F), lambda i: (i, 0)),
                  pl.BlockSpec(w1p.shape, lambda i: (0, 0)),
                  pl.BlockSpec(b1p.shape, lambda i: (0, 0)),
                  pl.BlockSpec(w2p.shape, lambda i: (0, 0)),
                  pl.BlockSpec(b2p.shape, lambda i: (0, 0)),
                  pl.BlockSpec(w3p.shape, lambda i: (0, 0)),
                  pl.BlockSpec(b3p.shape, lambda i: (0, 0))],
        out_specs=pl.BlockSpec((tile_m, n_out), lambda i: (i, 0)),
        compiler_params=pltpu.CompilerParams(
            dimension_semantics=("parallel",)),
    )(x, w1p, b1p, w2p, b2p, w3p, b3p)
    return out[:B]


# ------------------------------ parameters ----------------------------------

def _uniform(key, shape, fan_in):
    bound = 1.0 / jnp.sqrt(float(fan_in))
    return jax.random.uniform(key, shape, jnp.float32, -bound, bound)


def init_params(key):
    ks = jax.random.split(key, 10)
    return {
        "conv1_w": _uniform(ks[0], (6, 3, 5, 5), 3 * 5 * 5),
        "conv1_b": _uniform(ks[1], (6,), 3 * 5 * 5),
        "conv2_w": _uniform(ks[2], (16, 6, 5, 5), 6 * 5 * 5),
        "conv2_b": _uniform(ks[3], (16,), 6 * 5 * 5),
        "fc1_w": _uniform(ks[4], (120, 400), 400),
        "fc1_b": _uniform(ks[5], (120,), 400),
        "fc2_w": _uniform(ks[6], (84, 120), 120),
        "fc2_b": _uniform(ks[7], (84,), 120),
        "fc3_w": _uniform(ks[8], (10, 84), 84),
        "fc3_b": _uniform(ks[9], (10,), 84),
    }


def _embed_pool_phases(w, cin_phys, cout_pad, dtype):
    """Embed a (Cout, Cin, 5, 5) conv weight into four (cin_phys*36, cout_pad)
    matrices, one per 2x2-pool phase, matching conv_general_dilated_patches'
    (cin, kh, kw) feature order for a 6x6 stride-2 patch window."""
    cout, cin, kh, kw = w.shape
    mats = []
    for p in (0, 1):
        for q in (0, 1):
            w6 = jnp.zeros((cout_pad, cin_phys, 6, 6), jnp.float32)
            w6 = w6.at[:cout, :cin, p:p + kh, q:q + kw].set(w)
            mats.append(w6.reshape(cout_pad, cin_phys * 36).T)   # (K6, cout_pad)
    return jnp.stack(mats, 0).astype(dtype)                      # (4, K6, cout_pad)


def prepare_params(params, dtype=COMPUTE_DTYPE):
    """One-time (hoisted) weight preparation: pool-phase embedding, channel
    padding, FC transposes/pads, fc1 column permute to the kernel's (h, w, c)
    flatten order, and cast of matmul operands to the compute dtype."""
    p = {}
    p["conv1_w"] = _embed_pool_phases(params["conv1_w"], 3, C1_PAD, dtype)   # (4,108,8)
    p["conv1_b"] = jnp.pad(params["conv1_b"], (0, C1_PAD - 6)).reshape(1, C1_PAD)
    p["conv2_w"] = _embed_pool_phases(params["conv2_w"], C1_PAD, 16, dtype)  # (4,288,16)
    p["conv2_b"] = params["conv2_b"].reshape(1, 16)
    # fc1: permute columns from PyTorch's NCHW flatten (c,h,w) to kernel (h,w,c).
    w1 = (params["fc1_w"].reshape(120, 16, 5, 5)
          .transpose(0, 2, 3, 1).reshape(120, 400))
    p["fc1_w"] = jnp.pad(w1.T, ((0, 0), (0, 8))).astype(dtype)               # (400,128)
    p["fc1_b"] = jnp.pad(params["fc1_b"], (0, 8)).reshape(1, 128)
    p["fc2_w"] = jnp.pad(params["fc2_w"].T, ((0, 8), (0, 44))).astype(dtype)  # (128,128)
    p["fc2_b"] = jnp.pad(params["fc2_b"], (0, 44)).reshape(1, 128)
    p["fc3_w"] = jnp.pad(params["fc3_w"].T, ((0, 44), (0, 0))).astype(dtype)  # (128,10)
    p["fc3_b"] = params["fc3_b"].reshape(1, 10)
    return p


# -------------------------------- forward -----------------------------------

def lenet5_forward(prep, x):
    """x: (B, 3, 32, 32) float32 NCHW -> (B, 10) float32."""
    cdt = prep["conv1_w"].dtype
    x = jnp.transpose(x, (0, 2, 3, 1)).astype(cdt)                    # NHWC, once
    x = conv_pool_stage(x, prep["conv1_w"], prep["conv1_b"])          # (B,14,14,8)
    x = conv_pool_stage(x, prep["conv2_w"], prep["conv2_b"])          # (B,5,5,16)
    B = x.shape[0]
    x = x.reshape(B, 5 * 5 * 16)                                      # (h,w,c) order
    return fc_block(x, prep["fc1_w"], prep["fc1_b"],
                    prep["fc2_w"], prep["fc2_b"],
                    prep["fc3_w"], prep["fc3_b"])


# --------------------------- pure-JAX reference -----------------------------

def lenet5_reference(params, x):
    def conv(x, w, b):
        y = jax.lax.conv_general_dilated(
            x, w, window_strides=(1, 1), padding="VALID",
            dimension_numbers=("NCHW", "OIHW", "NCHW"))
        return jax.nn.relu(y + b.reshape(1, -1, 1, 1))

    def pool(x):
        B, C, H, W = x.shape
        return x.reshape(B, C, H // 2, 2, W // 2, 2).max(axis=(3, 5))

    x = pool(conv(x, params["conv1_w"], params["conv1_b"]))
    x = pool(conv(x, params["conv2_w"], params["conv2_b"]))
    x = x.reshape(-1, 400)
    x = jax.nn.relu(x @ params["fc1_w"].T + params["fc1_b"])
    x = jax.nn.relu(x @ params["fc2_w"].T + params["fc2_b"])
    return x @ params["fc3_w"].T + params["fc3_b"]


if __name__ == "__main__":
    key = jax.random.PRNGKey(0)
    pkey, xkey = jax.random.split(key)
    params = init_params(pkey)
    prep = prepare_params(params)     # hoisted, one-time weight preparation

    # Input shape implied by the module: 3x32x32 so 2x(conv5 + pool2) -> 16x5x5.
    x = jax.random.normal(xkey, (2, 3, 32, 32), jnp.float32)

    out = jax.block_until_ready(jax.jit(lenet5_forward)(prep, x))
    ref = jax.block_until_ready(jax.jit(lenet5_reference)(params, x))

    assert out.shape == (2, 10), out.shape
    tol = 5e-2 if COMPUTE_DTYPE == jnp.bfloat16 else 1e-4
    assert jnp.allclose(out, ref, atol=tol, rtol=tol), (
        float(jnp.max(jnp.abs(out - ref))))
    print("KERNEL_OK")
</pallas_src>

<mosaic_0001>
module attributes {stable_mosaic.version = 11 : i64} {
  func.func @_conv_pool_kernel(%arg0: i32, %arg1: memref<1x196x108xbf16, #tpu.memory_space<vmem>>, %arg2: memref<4x108x8xbf16, #tpu.memory_space<vmem>>, %arg3: memref<1x8xf32, #tpu.memory_space<vmem>>, %arg4: memref<1x196x8xbf16, #tpu.memory_space<vmem>>) attributes {dimension_semantics = [#tpu.dimension_semantics<parallel>], iteration_bounds = array<i64: 2>, scalar_prefetch = 0 : i64, scratch_operands = 0 : i64, tpu.core_type = #tpu.core_type<tc>, window_params = [{transform_indices = @transform_0, window_bounds = array<i64: 1, 196, 108>}, {pipeline_mode = #tpu.pipeline_mode<synchronous>, transform_indices = @transform_1, window_bounds = array<i64: 4, 108, 8>}, {pipeline_mode = #tpu.pipeline_mode<synchronous>, transform_indices = @transform_2, window_bounds = array<i64: 1, 8>}, {transform_indices = @transform_3, window_bounds = array<i64: 1, 196, 8>}]} {
    %c0 = arith.constant 0 : index
    %c0_0 = arith.constant 0 : index
    %c0_1 = arith.constant 0 : index
    %0 = vector.load %arg2[%c0, %c0_0, %c0_1] : memref<4x108x8xbf16, #tpu.memory_space<vmem>>, vector<1x108x8xbf16>
    %1 = vector.shape_cast %0 : vector<1x108x8xbf16> to vector<108x8xbf16>
    %c1 = arith.constant 1 : index
    %c0_2 = arith.constant 0 : index
    %c0_3 = arith.constant 0 : index
    %2 = vector.load %arg2[%c1, %c0_2, %c0_3] : memref<4x108x8xbf16, #tpu.memory_space<vmem>>, vector<1x108x8xbf16>
    %3 = vector.shape_cast %2 : vector<1x108x8xbf16> to vector<108x8xbf16>
    %c2 = arith.constant 2 : index
    %c0_4 = arith.constant 0 : index
    %c0_5 = arith.constant 0 : index
    %4 = vector.load %arg2[%c2, %c0_4, %c0_5] : memref<4x108x8xbf16, #tpu.memory_space<vmem>>, vector<1x108x8xbf16>
    %5 = vector.shape_cast %4 : vector<1x108x8xbf16> to vector<108x8xbf16>
    %c3 = arith.constant 3 : index
    %c0_6 = arith.constant 0 : index
    %c0_7 = arith.constant 0 : index
    %6 = vector.load %arg2[%c3, %c0_6, %c0_7] : memref<4x108x8xbf16, #tpu.memory_space<vmem>>, vector<1x108x8xbf16>
    %7 = vector.shape_cast %6 : vector<1x108x8xbf16> to vector<108x8xbf16>
    %c0_8 = arith.constant 0 : index
    %c0_9 = arith.constant 0 : index
    %8 = vector.load %arg3[%c0_8, %c0_9] : memref<1x8xf32, #tpu.memory_space<vmem>>, vector<1x8xf32>
    %c0_i32 = arith.constant 0 : i32
    %9 = arith.index_cast %c0_i32 : i32 to index
    %c0_10 = arith.constant 0 : index
    %c0_11 = arith.constant 0 : index
    %10 = vector.load %arg1[%9, %c0_10, %c0_11] : memref<1x196x108xbf16, #tpu.memory_space<vmem>>, vector<1x196x108xbf16>
    %11 = vector.shape_cast %10 : vector<1x196x108xbf16> to vector<196x108xbf16>
    %cst = arith.constant dense<0.000000e+00> : vector<196x8xf32>
    %12 = tpu.matmul %11, %1, %cst {dimension_numbers = #tpu.dot_dimension_numbers<[1], [0], [0], [1], [0, 0, 1, 1], [], []>} : vector<196x108xbf16>, vector<108x8xbf16>, vector<196x8xf32> -> vector<196x8xf32>
    %cst_12 = arith.constant dense<0.000000e+00> : vector<196x8xf32>
    %13 = tpu.matmul %11, %3, %cst_12 {dimension_numbers = #tpu.dot_dimension_numbers<[1], [0], [0], [1], [0, 0, 1, 1], [], []>} : vector<196x108xbf16>, vector<108x8xbf16>, vector<196x8xf32> -> vector<196x8xf32>
    %14 = arith.maximumf %12, %13 : vector<196x8xf32>
    %cst_13 = arith.constant dense<0.000000e+00> : vector<196x8xf32>
    %15 = tpu.matmul %11, %5, %cst_13 {dimension_numbers = #tpu.dot_dimension_numbers<[1], [0], [0], [1], [0, 0, 1, 1], [], []>} : vector<196x108xbf16>, vector<108x8xbf16>, vector<196x8xf32> -> vector<196x8xf32>
    %16 = arith.maximumf %14, %15 : vector<196x8xf32>
    %cst_14 = arith.constant dense<0.000000e+00> : vector<196x8xf32>
    %17 = tpu.matmul %11, %7, %cst_14 {dimension_numbers = #tpu.dot_dimension_numbers<[1], [0], [0], [1], [0, 0, 1, 1], [], []>} : vector<196x108xbf16>, vector<108x8xbf16>, vector<196x8xf32> -> vector<196x8xf32>
    %18 = arith.maximumf %16, %17 : vector<196x8xf32>
    %19 = vector.broadcast %8 : vector<1x8xf32> to vector<196x8xf32>
    %20 = arith.addf %18, %19 : vector<196x8xf32>
    %cst_15 = arith.constant 0.000000e+00 : f32
    %21 = vector.broadcast %cst_15 : f32 to vector<196x8xf32>
    %22 = arith.maximumf %20, %21 : vector<196x8xf32>
    %23 = arith.truncf %22 : vector<196x8xf32> to vector<196x8xbf16>
    %24 = arith.index_cast %c0_i32 : i32 to index
    %c0_16 = arith.constant 0 : index
    %c0_17 = arith.constant 0 : index
    %25 = vector.load %arg4[%24, %c0_16, %c0_17] : memref<1x196x8xbf16, #tpu.memory_space<vmem>>, vector<1x196x8xbf16>
    %26 = vector.shape_cast %25 : vector<1x196x8xbf16> to vector<196x8xbf16>
    %27 = vector.shape_cast %23 : vector<196x8xbf16> to vector<1x196x8xbf16>
    tpu.vector_store %arg4[%24, %c0_16, %c0_17], %27 {strides = array<i32>} : memref<1x196x8xbf16, #tpu.memory_space<vmem>>, vector<1x196x8xbf16>,
    %c1_i32 = arith.constant 1 : i32
    return
  }
  func.func @transform_0(%arg0: i32) -> (i32, i32, i32) {
    %c0_i32 = arith.constant 0 : i32
    %c0_i32_0 = arith.constant 0 : i32
    %c0_i32_1 = arith.constant 0 : i32
    return %arg0, %c0_i32, %c0_i32_0 : i32, i32, i32
  }
  func.func @transform_1(%arg0: i32) -> (i32, i32, i32) {
    %c0_i32 = arith.constant 0 : i32
    %c0_i32_0 = arith.constant 0 : i32
    %c0_i32_1 = arith.constant 0 : i32
    %c0_i32_2 = arith.constant 0 : i32
    return %c0_i32, %c0_i32_0, %c0_i32_1 : i32, i32, i32
  }
  func.func @transform_2(%arg0: i32) -> (i32, i32) {
    %c0_i32 = arith.constant 0 : i32
    %c0_i32_0 = arith.constant 0 : i32
    %c0_i32_1 = arith.constant 0 : i32
    return %c0_i32, %c0_i32_0 : i32, i32
  }
  func.func @transform_3(%arg0: i32) -> (i32, i32, i32) {
    %c0_i32 = arith.constant 0 : i32
    %c0_i32_0 = arith.constant 0 : i32
    %c0_i32_1 = arith.constant 0 : i32
    return %arg0, %c0_i32, %c0_i32_0 : i32, i32, i32
  }
}

module attributes {stable_mosaic.version = 11 : i64} {
  func.func @_conv_pool_kernel(%arg0: i32, %arg1: memref<1x25x288xbf16, #tpu.memory_space<vmem>>, %arg2: memref<4x288x16xbf16, #tpu.memory_space<vmem>>, %arg3: memref<1x16xf32, #tpu.memory_space<vmem>>, %arg4: memref<1x25x16xbf16, #tpu.memory_space<vmem>>) attributes {dimension_semantics = [#tpu.dimension_semantics<parallel>], iteration_bounds = array<i64: 2>, scalar_prefetch = 0 : i64, scratch_operands = 0 : i64, tpu.core_type = #tpu.core_type<tc>, window_params = [{transform_indices = @transform_0, window_bounds = array<i64: 1, 25, 288>}, {pipeline_mode = #tpu.pipeline_mode<synchronous>, transform_indices = @transform_1, window_bounds = array<i64: 4, 288, 16>}, {pipeline_mode = #tpu.pipeline_mode<synchronous>, transform_indices = @transform_2, window_bounds = array<i64: 1, 16>}, {transform_indices = @transform_3, window_bounds = array<i64: 1, 25, 16>}]} {
    %c0 = arith.constant 0 : index
    %c0_0 = arith.constant 0 : index
    %c0_1 = arith.constant 0 : index
    %0 = vector.load %arg2[%c0, %c0_0, %c0_1] : memref<4x288x16xbf16, #tpu.memory_space<vmem>>, vector<1x288x16xbf16>
    %1 = vector.shape_cast %0 : vector<1x288x16xbf16> to vector<288x16xbf16>
    %c1 = arith.constant 1 : index
    %c0_2 = arith.constant 0 : index
    %c0_3 = arith.constant 0 : index
    %2 = vector.load %arg2[%c1, %c0_2, %c0_3] : memref<4x288x16xbf16, #tpu.memory_space<vmem>>, vector<1x288x16xbf16>
    %3 = vector.shape_cast %2 : vector<1x288x16xbf16> to vector<288x16xbf16>
    %c2 = arith.constant 2 : index
    %c0_4 = arith.constant 0 : index
    %c0_5 = arith.constant 0 : index
    %4 = vector.load %arg2[%c2, %c0_4, %c0_5] : memref<4x288x16xbf16, #tpu.memory_space<vmem>>, vector<1x288x16xbf16>
    %5 = vector.shape_cast %4 : vector<1x288x16xbf16> to vector<288x16xbf16>
    %c3 = arith.constant 3 : index
    %c0_6 = arith.constant 0 : index
    %c0_7 = arith.constant 0 : index
    %6 = vector.load %arg2[%c3, %c0_6, %c0_7] : memref<4x288x16xbf16, #tpu.memory_space<vmem>>, vector<1x288x16xbf16>
    %7 = vector.shape_cast %6 : vector<1x288x16xbf16> to vector<288x16xbf16>
    %c0_8 = arith.constant 0 : index
    %c0_9 = arith.constant 0 : index
    %8 = vector.load %arg3[%c0_8, %c0_9] : memref<1x16xf32, #tpu.memory_space<vmem>>, vector<1x16xf32>
    %c0_i32 = arith.constant 0 : i32
    %9 = arith.index_cast %c0_i32 : i32 to index
    %c0_10 = arith.constant 0 : index
    %c0_11 = arith.constant 0 : index
    %10 = vector.load %arg1[%9, %c0_10, %c0_11] : memref<1x25x288xbf16, #tpu.memory_space<vmem>>, vector<1x25x288xbf16>
    %11 = vector.shape_cast %10 : vector<1x25x288xbf16> to vector<25x288xbf16>
    %cst = arith.constant dense<0.000000e+00> : vector<25x16xf32>
    %12 = tpu.matmul %11, %1, %cst {dimension_numbers = #tpu.dot_dimension_numbers<[1], [0], [0], [1], [0, 0, 1, 1], [], []>} : vector<25x288xbf16>, vector<288x16xbf16>, vector<25x16xf32> -> vector<25x16xf32>
    %cst_12 = arith.constant dense<0.000000e+00> : vector<25x16xf32>
    %13 = tpu.matmul %11, %3, %cst_12 {dimension_numbers = #tpu.dot_dimension_numbers<[1], [0], [0], [1], [0, 0, 1, 1], [], []>} : vector<25x288xbf16>, vector<288x16xbf16>, vector<25x16xf32> -> vector<25x16xf32>
    %14 = arith.maximumf %12, %13 : vector<25x16xf32>
    %cst_13 = arith.constant dense<0.000000e+00> : vector<25x16xf32>
    %15 = tpu.matmul %11, %5, %cst_13 {dimension_numbers = #tpu.dot_dimension_numbers<[1], [0], [0], [1], [0, 0, 1, 1], [], []>} : vector<25x288xbf16>, vector<288x16xbf16>, vector<25x16xf32> -> vector<25x16xf32>
    %16 = arith.maximumf %14, %15 : vector<25x16xf32>
    %cst_14 = arith.constant dense<0.000000e+00> : vector<25x16xf32>
    %17 = tpu.matmul %11, %7, %cst_14 {dimension_numbers = #tpu.dot_dimension_numbers<[1], [0], [0], [1], [0, 0, 1, 1], [], []>} : vector<25x288xbf16>, vector<288x16xbf16>, vector<25x16xf32> -> vector<25x16xf32>
    %18 = arith.maximumf %16, %17 : vector<25x16xf32>
    %19 = vector.broadcast %8 : vector<1x16xf32> to vector<25x16xf32>
    %20 = arith.addf %18, %19 : vector<25x16xf32>
    %cst_15 = arith.constant 0.000000e+00 : f32
    %21 = vector.broadcast %cst_15 : f32 to vector<25x16xf32>
    %22 = arith.maximumf %20, %21 : vector<25x16xf32>
    %23 = arith.truncf %22 : vector<25x16xf32> to vector<25x16xbf16>
    %24 = arith.index_cast %c0_i32 : i32 to index
    %c0_16 = arith.constant 0 : index
    %c0_17 = arith.constant 0 : index
    %25 = vector.load %arg4[%24, %c0_16, %c0_17] : memref<1x25x16xbf16, #tpu.memory_space<vmem>>, vector<1x25x16xbf16>
    %26 = vector.shape_cast %25 : vector<1x25x16xbf16> to vector<25x16xbf16>
    %27 = vector.shape_cast %23 : vector<25x16xbf16> to vector<1x25x16xbf16>
    tpu.vector_store %arg4[%24, %c0_16, %c0_17], %27 {strides = array<i32>} : memref<1x25x16xbf16, #tpu.memory_space<vmem>>, vector<1x25x16xbf16>,
    %c1_i32 = arith.constant 1 : i32
    return
  }
  func.func @transform_0(%arg0: i32) -> (i32, i32, i32) {
    %c0_i32 = arith.constant 0 : i32
    %c0_i32_0 = arith.constant 0 : i32
    %c0_i32_1 = arith.constant 0 : i32
    return %arg0, %c0_i32, %c0_i32_0 : i32, i32, i32
  }
  func.func @transform_1(%arg0: i32) -> (i32, i32, i32) {
    %c0_i32 = arith.constant 0 : i32
    %c0_i32_0 = arith.constant 0 : i32
    %c0_i32_1 = arith.constant 0 : i32
    %c0_i32_2 = arith.constant 0 : i32
    return %c0_i32, %c0_i32_0, %c0_i32_1 : i32, i32, i32
  }
  func.func @transform_2(%arg0: i32) -> (i32, i32) {
    %c0_i32 = arith.constant 0 : i32
    %c0_i32_0 = arith.constant 0 : i32
    %c0_i32_1 = arith.constant 0 : i32
    return %c0_i32, %c0_i32_0 : i32, i32
  }
  func.func @transform_3(%arg0: i32) -> (i32, i32, i32) {
    %c0_i32 = arith.constant 0 : i32
    %c0_i32_0 = arith.constant 0 : i32
    %c0_i32_1 = arith.constant 0 : i32
    return %arg0, %c0_i32, %c0_i32_0 : i32, i32, i32
  }
}

module attributes {stable_mosaic.version = 11 : i64} {
  func.func @_fc_block_kernel(%arg0: i32, %arg1: memref<8x400xbf16, #tpu.memory_space<vmem>>, %arg2: memref<400x128xbf16, #tpu.memory_space<vmem>>, %arg3: memref<1x128xf32, #tpu.memory_space<vmem>>, %arg4: memref<128x128xbf16, #tpu.memory_space<vmem>>, %arg5: memref<1x128xf32, #tpu.memory_space<vmem>>, %arg6: memref<128x10xbf16, #tpu.memory_space<vmem>>, %arg7: memref<1x10xf32, #tpu.memory_space<vmem>>, %arg8: memref<8x10xf32, #tpu.memory_space<vmem>>) attributes {dimension_semantics = [#tpu.dimension_semantics<parallel>], iteration_bounds = array<i64: 1>, scalar_prefetch = 0 : i64, scratch_operands = 0 : i64, tpu.core_type = #tpu.core_type<tc>, window_params = [{transform_indices = @transform_0, window_bounds = array<i64: 8, 400>}, {pipeline_mode = #tpu.pipeline_mode<synchronous>, transform_indices = @transform_1, window_bounds = array<i64: 400, 128>}, {pipeline_mode = #tpu.pipeline_mode<synchronous>, transform_indices = @transform_2, window_bounds = array<i64: 1, 128>}, {pipeline_mode = #tpu.pipeline_mode<synchronous>, transform_indices = @transform_3, window_bounds = array<i64: 128, 128>}, {pipeline_mode = #tpu.pipeline_mode<synchronous>, transform_indices = @transform_4, window_bounds = array<i64: 1, 128>}, {pipeline_mode = #tpu.pipeline_mode<synchronous>, transform_indices = @transform_5, window_bounds = array<i64: 128, 10>}, {pipeline_mode = #tpu.pipeline_mode<synchronous>, transform_indices = @transform_6, window_bounds = array<i64: 1, 10>}, {transform_indices = @transform_7, window_bounds = array<i64: 8, 10>}]} {
    %c0 = arith.constant 0 : index
    %c0_0 = arith.constant 0 : index
    %0 = vector.load %arg1[%c0, %c0_0] : memref<8x400xbf16, #tpu.memory_space<vmem>>, vector<8x400xbf16>
    %c0_1 = arith.constant 0 : index
    %c0_2 = arith.constant 0 : index
    %1 = vector.load %arg2[%c0_1, %c0_2] : memref<400x128xbf16, #tpu.memory_space<vmem>>, vector<400x128xbf16>
    %cst = arith.constant dense<0.000000e+00> : vector<8x128xf32>
    %2 = tpu.matmul %0, %1, %cst {dimension_numbers = #tpu.dot_dimension_numbers<[1], [0], [0], [1], [0, 0, 1, 1], [], []>} : vector<8x400xbf16>, vector<400x128xbf16>, vector<8x128xf32> -> vector<8x128xf32>
    %c0_3 = arith.constant 0 : index
    %c0_4 = arith.constant 0 : index
    %3 = vector.load %arg3[%c0_3, %c0_4] : memref<1x128xf32, #tpu.memory_space<vmem>>, vector<1x128xf32>
    %4 = vector.broadcast %3 : vector<1x128xf32> to vector<8x128xf32>
    %5 = arith.addf %2, %4 : vector<8x128xf32>
    %cst_5 = arith.constant 0.000000e+00 : f32
    %6 = vector.broadcast %cst_5 : f32 to vector<8x128xf32>
    %7 = arith.maximumf %5, %6 : vector<8x128xf32>
    %8 = arith.truncf %7 : vector<8x128xf32> to vector<8x128xbf16>
    %c0_6 = arith.constant 0 : index
    %c0_7 = arith.constant 0 : index
    %9 = vector.load %arg4[%c0_6, %c0_7] : memref<128x128xbf16, #tpu.memory_space<vmem>>, vector<128x128xbf16>
    %cst_8 = arith.constant dense<0.000000e+00> : vector<8x128xf32>
    %10 = tpu.matmul %8, %9, %cst_8 {dimension_numbers = #tpu.dot_dimension_numbers<[1], [0], [0], [1], [0, 0, 1, 1], [], []>} : vector<8x128xbf16>, vector<128x128xbf16>, vector<8x128xf32> -> vector<8x128xf32>
    %c0_9 = arith.constant 0 : index
    %c0_10 = arith.constant 0 : index
    %11 = vector.load %arg5[%c0_9, %c0_10] : memref<1x128xf32, #tpu.memory_space<vmem>>, vector<1x128xf32>
    %12 = vector.broadcast %11 : vector<1x128xf32> to vector<8x128xf32>
    %13 = arith.addf %10, %12 : vector<8x128xf32>
    %cst_11 = arith.constant 0.000000e+00 : f32
    %14 = vector.broadcast %cst_11 : f32 to vector<8x128xf32>
    %15 = arith.maximumf %13, %14 : vector<8x128xf32>
    %16 = arith.truncf %15 : vector<8x128xf32> to vector<8x128xbf16>
    %c0_12 = arith.constant 0 : index
    %c0_13 = arith.constant 0 : index
    %17 = vector.load %arg6[%c0_12, %c0_13] : memref<128x10xbf16, #tpu.memory_space<vmem>>, vector<128x10xbf16>
    %cst_14 = arith.constant dense<0.000000e+00> : vector<8x10xf32>
    %18 = tpu.matmul %16, %17, %cst_14 {dimension_numbers = #tpu.dot_dimension_numbers<[1], [0], [0], [1], [0, 0, 1, 1], [], []>} : vector<8x128xbf16>, vector<128x10xbf16>, vector<8x10xf32> -> vector<8x10xf32>
    %c0_15 = arith.constant 0 : index
    %c0_16 = arith.constant 0 : index
    %19 = vector.load %arg7[%c0_15, %c0_16] : memref<1x10xf32, #tpu.memory_space<vmem>>, vector<1x10xf32>
    %20 = vector.broadcast %19 : vector<1x10xf32> to vector<8x10xf32>
    %21 = arith.addf %18, %20 : vector<8x10xf32>
    %c0_17 = arith.constant 0 : index
    %c0_18 = arith.constant 0 : index
    %22 = vector.load %arg8[%c0_17, %c0_18] : memref<8x10xf32, #tpu.memory_space<vmem>>, vector<8x10xf32>
    tpu.vector_store %arg8[%c0_17, %c0_18], %21 {strides = array<i32>} : memref<8x10xf32, #tpu.memory_space<vmem>>, vector<8x10xf32>,
    return
  }
  func.func @transform_0(%arg0: i32) -> (i32, i32) {
    %c0_i32 = arith.constant 0 : i32
    %c0_i32_0 = arith.constant 0 : i32
    return %arg0, %c0_i32 : i32, i32
  }
  func.func @transform_1(%arg0: i32) -> (i32, i32) {
    %c0_i32 = arith.constant 0 : i32
    %c0_i32_0 = arith.constant 0 : i32
    %c0_i32_1 = arith.constant 0 : i32
    return %c0_i32, %c0_i32_0 : i32, i32
  }
  func.func @transform_2(%arg0: i32) -> (i32, i32) {
    %c0_i32 = arith.constant 0 : i32
    %c0_i32_0 = arith.constant 0 : i32
    %c0_i32_1 = arith.constant 0 : i32
    return %c0_i32, %c0_i32_0 : i32, i32
  }
  func.func @transform_3(%arg0: i32) -> (i32, i32) {
    %c0_i32 = arith.constant 0 : i32
    %c0_i32_0 = arith.constant 0 : i32
    %c0_i32_1 = arith.constant 0 : i32
    return %c0_i32, %c0_i32_0 : i32, i32
  }
  func.func @transform_4(%arg0: i32) -> (i32, i32) {
    %c0_i32 = arith.constant 0 : i32
    %c0_i32_0 = arith.constant 0 : i32
    %c0_i32_1 = arith.constant 0 : i32
    return %c0_i32, %c0_i32_0 : i32, i32
  }
  func.func @transform_5(%arg0: i32) -> (i32, i32) {
    %c0_i32 = arith.constant 0 : i32
    %c0_i32_0 = arith.constant 0 : i32
    %c0_i32_1 = arith.constant 0 : i32
    return %c0_i32, %c0_i32_0 : i32, i32
  }
  func.func @transform_6(%arg0: i32) -> (i32, i32) {
    %c0_i32 = arith.constant 0 : i32
    %c0_i32_0 = arith.constant 0 : i32
    %c0_i32_1 = arith.constant 0 : i32
    return %c0_i32, %c0_i32_0 : i32, i32
  }
  func.func @transform_7(%arg0: i32) -> (i32, i32) {
    %c0_i32 = arith.constant 0 : i32
    %c0_i32_0 = arith.constant 0 : i32
    return %arg0, %c0_i32 : i32, i32
  }
}

</mosaic_0001>

<bundles_post_ra>
// kernel: lenet5_forward.3
= control target key start
LH: loop header
LB: loop body
LE: loop exit
PB: predicated region body
PF: predicated region fallthrough
CT: control target
= control target key end

     0   :  { %s2016_s12 = smov 0   ;;  %s2657_s0 = inlined_call_operand.vmem [shape: bf16[2,196,108], index: 0, kind: input, shape index: {}]   ;;  %s2658_s1 = inlined_call_operand.vmem [shape: bf16[4,108,8], index: 1, kind: input, shape index: {}]   ;;  %s2659_s2 = inlined_call_operand.vmem [shape: f32[1,8], index: 2, kind: input, shape index: {}]   ;;  %s2660_s3 = inlined_call_operand.vmem [shape: bf16[2,196,8], index: 3, kind: output, shape index: {}]  }
   0x1 LB: > { %s1395_s13 = sadd.s32 4294967295, %s1992_s12   ;;  %p1399_p0 = scmp.ge.s32.totalorder %s1992_s12, 1  ;;  %s1992_s12 = sphi %s2016_s12, %s13_s12  }
   0x2   : > { %p137_p1 = scmp.lt.s32.totalorder %s1992_s12, 3 }
   0x4   : > { %p138_p2 = pnand %p1399_p0, %p137_p1 }
   0x5   : > { %v1945_v0 = vld [vmem:[%s2658_s1] sm:$0xff] (!%p138_p2)   ;;  %v1994_v1 = vmov (!%p138_p2), 0.0   ;;  %v1946_v2 = vld [vmem:[%s2658_s1 + $0x38] sm:$0xff] (!%p138_p2)   ;;  %v1947_v3 = vld [vmem:[%s2658_s1 + $0x8] sm:$0xff] (!%p138_p2)   ;;  %p161_p3 = scmp.lt.s32.totalorder (!%p138_p2), %s1395_s13, 1  ;;  %vm1995_vm0 = vmmov (!%p138_p2), 0  }
   0x6   : > { %141 = sbr.rel (%p138_p2) target bundleno = 457 (0x1c9), region = 32  ;;  %1670 = vmatprep.subr.bf16.mxu0 (!%p138_p2), %v1994_v1  ;;  %1736 = vmatprep.subr.bf16.mxu1 (!%p138_p2), %v1994_v1  ;;  %v1948_v4 = vld [vmem:[%s2658_s1 + $0x40] sm:$0xff] (!%p138_p2)   ;;  %v1949_v5 = vld [vmem:[%s2658_s1 + $0x10] sm:$0xff] (!%p138_p2)   ;;  %v1950_v6 = vld [vmem:[%s2658_s1 + $0x48] sm:$0xff] (!%p138_p2)   ;;  %vm401_vm1 = vcmask (!%p138_p2), 1045504   ;;  %vm361_vm2 = vcmask (!%p138_p2), 883712  }
   0x7   : > { %1671 = vmatpush3.bf16.msra.mxu0 (!%p138_p2), %v1945_v0  ;;  %1737 = vmatpush3.bf16.msra.mxu1 (!%p138_p2), %v1946_v2  ;;  %v1951_v7 = vld [vmem:[%s2658_s1 + $0x18] sm:$0xff] (!%p138_p2)   ;;  %v1952_v8 = vld [vmem:[%s2658_s1 + $0x50] sm:$0xff] (!%p138_p2)   ;;  %v1953_v9 = vld [vmem:[%s2658_s1 + $0x20] sm:$0xff] (!%p138_p2)   ;;  %vm1313_vm3 = vcmask (!%p138_p2), 60416   ;;  %vm1338_vm4 = vcmask (!%p138_p2), 58368  }
   0x8   : > { %1672 = vmatprep.subr.bf16.mxu0 (!%p138_p2), %v1994_v1  ;;  %1738 = vmatprep.subr.bf16.mxu1 (!%p138_p2), %v1994_v1  ;;  %v1954_v10 = vld [vmem:[%s2658_s1 + $0x58] sm:$0xff] (!%p138_p2)   ;;  %v1955_v11 = vld [vmem:[%s2658_s1 + $0x28] sm:$0xff] (!%p138_p2)   ;;  %v1956_v12 = vld [vmem:[%s2658_s1 + $0x60] sm:$0xff] (!%p138_p2)  }
   0x9   : > { %1684 = vmatprep.mubr.msk.bf16.mxu0 (!%p138_p2), %vm1995_vm0, %v1994_v1  ;;  %1750 = vmatprep.mubr.msk.bf16.mxu1 (!%p138_p2), %vm1995_vm0, %v1994_v1  ;;  %v1957_v13 = vld [vmem:[%s2658_s1 + $0x30] sm:$0x3f] (!%p138_p2)   ;;  %v1958_v14 = vld [vmem:[%s2658_s1 + $0x68] sm:$0x3f] (!%p138_p2)   ;;  %v1964_v20 = vld [vmem:[%s2658_s1 + $0x78] sm:$0xff] (!%p138_p2)  }
   0xa   : > { %v403_v15 = vsel (!%p138_p2), %vm401_vm1, %v1957_v13, 0  ;;  %v583_v16 = vsel (!%p138_p2), %vm401_vm1, %v1958_v14, 0  ;;  %v1960_v18 = vld [vmem:[%s2658_s1 + $0x70] sm:$0xff] (!%p138_p2)   ;;  %v1961_v19 = vld [vmem:[%s2658_s1 + $0xa8] sm:$0xff] (!%p138_p2)   ;;  %v1967_v23 = vld [vmem:[%s2658_s1 + $0x80] sm:$0xff] (!%p138_p2)  }
   0xb   : > { %1673 = vmatpush3.bf16.msra.mxu0 (!%p138_p2), %v1947_v3  ;;  %1739 = vmatpush3.bf16.msra.mxu1 (!%p138_p2), %v1948_v4  ;;  %v1965_v21 = vld [vmem:[%s2658_s1 + $0xb0] sm:$0xff] (!%p138_p2)   ;;  %v1969_v24 = vld [vmem:[%s2658_s1 + $0xb8] sm:$0xff] (!%p138_p2)   ;;  %v1971_v25 = vld [vmem:[%s2658_s1 + $0x88] sm:$0xff] (!%p138_p2)  }
   0xc   : > { %1674 = vmatprep.subr.bf16.mxu0 (!%p138_p2), %v1994_v1  ;;  %1740 = vmatprep.subr.bf16.mxu1 (!%p138_p2), %v1994_v1  ;;  %v1973_v26 = vld [vmem:[%s2658_s1 + $0xc0] sm:$0xff] (!%p138_p2)   ;;  %v1975_v28 = vld [vmem:[%s2658_s1 + $0x90] sm:$0xff] (!%p138_p2)   ;;  %v1976_v29 = vld [vmem:[%s2658_s1 + $0xc8] sm:$0xff] (!%p138_p2)  }
   0xd   : > { %s2685_s13 = smov (!%p161_p3, %s1395_s13), 1  ;;  %v1979_v30 = vld [vmem:[%s2658_s1 + $0x98] sm:$0xff]   ;;  %v1980_v31 = vld [vmem:[%s2658_s1 + $0xd0] sm:$0xff]   ;;  %v1983_v32 = vld [vmem:[%s2658_s1 + $0xa0] sm:$0x3f]  }
   0xe   : > { %s1934_s26 = smul.u32 100, %s2685_s13  ;;  %v1984_v34 = vld [vmem:[%s2658_s1 + $0xd8] sm:$0x3f]   ;;  %v788_v35 = vsel %vm401_vm1, %v1983_v32, 0 }
   0xf   : > { %1675 = vmatpush3.bf16.msra.mxu0 %v1949_v5  ;;  %1741 = vmatpush3.bf16.msra.mxu1 %v1950_v6  ;;  %v993_v36 = vsel %vm401_vm1, %v1984_v34, 0 }
  0x10   : > { %1676 = vmatprep.subr.bf16.mxu0 %v1994_v1  ;;  %1742 = vmatprep.subr.bf16.mxu1 %v1994_v1  ;;  %s2068_s6 = scalar_lea.vmem %s2657_s0, %s1934_s26  ;;  %s2511_s30 = scalar_lea.vmem %s2660_s3, %s1934_s26 }
  0x11   : > { %v2097_v17 = vld [vmem:[%s2068_s6] sm:$0xff]   ;;  %v2123_v22 = vld [vmem:[%s2068_s6 + $0x8] sm:$0xff]   ;;  %v2150_v27 = vld [vmem:[%s2068_s6 + $0x10] sm:$0xff]  }
  0x12   : > { %v2180_v33 = vld [vmem:[%s2068_s6 + $0x18] sm:$0xff]   ;;  %v1968_v37 = vld [vmem:[%s2068_s6 + $0x20] sm:$0xff]   ;;  %v1970_v38 = vld [vmem:[%s2068_s6 + $0x28] sm:$0xff]  }
  0x13   : > { %1677 = vmatpush3.bf16.msra.mxu0 %v1951_v7  ;;  %1743 = vmatpush3.bf16.msra.mxu1 %v1952_v8  ;;  %v1972_v39 = vld [vmem:[%s2068_s6 + $0x30] sm:$0xff]   ;;  %v1974_v40 = vld [vmem:[%s2068_s6 + $0x38] sm:$0xff]   ;;  %v1977_v41 = vld [vmem:[%s2068_s6 + $0x40] sm:$0xff]  }
  0x14   : > { %1678 = vmatprep.subr.bf16.mxu0 %v1994_v1  ;;  %1744 = vmatprep.subr.bf16.mxu1 %v1994_v1  ;;  %v1978_v42 = vld [vmem:[%s2068_s6 + $0x48] sm:$0xff]   ;;  %v1981_v43 = vld [vmem:[%s2068_s6 + $0x50] sm:$0xff]   ;;  %v1982_v44 = vld [vmem:[%s2068_s6 + $0x58] sm:$0xff]  }
  0x15   : > { %v1985_v45 = vld [vmem:[%s2068_s6 + $0x60] ss:$0 sps:$4 sm:$0x33]  }
  0x17   : > { %1679 = vmatpush3.bf16.msra.mxu0 %v1953_v9  ;;  %1745 = vmatpush3.bf16.msra.mxu1 %v1954_v10 }
  0x18   : > { %1680 = vmatprep.subr.bf16.mxu0 %v1994_v1  ;;  %1746 = vmatprep.subr.bf16.mxu1 %v1994_v1 }
  0x1b   : > { %1681 = vmatpush3.bf16.msra.mxu0 %v1955_v11  ;;  %1747 = vmatpush3.bf16.msra.mxu1 %v1956_v12 }
  0x1c   : > { %1682 = vmatprep.subr.bf16.mxu0 %v1994_v1  ;;  %1748 = vmatprep.subr.bf16.mxu1 %v1994_v1 }
  0x1f   : > { %1683 = vmatpush3.bf16.msra.mxu0 %v403_v15  ;;  %1749 = vmatpush3.bf16.msra.mxu1 %v583_v16 }
  0x20   : > { %1802 = vmatprep.subr.bf16.mxu0 %v1994_v1  ;;  %1868 = vmatprep.subr.bf16.mxu1 %v1994_v1 }
  0x22   : > { %1685 = vmatmul.mubr.msk.bf16.vlgmr.msra.gmra.mrb[0].mxu0 %vm361_vm2, %v2097_v17  ;;  %1751 = vmatmul.mubr.msk.bf16.vlgmr.msra.gmra.mrb[0].mxu1 %vm361_vm2, %v2097_v17 }
  0x23   : > { %1803 = vmatpush3.bf16.msra.mxu0 %v1960_v18  ;;  %1869 = vmatpush3.bf16.msra.mxu1 %v1961_v19 }
  0x24   : > { %1688 = vmatprep.mubr.msk.bf16.mxu0 %vm1995_vm0, %v1994_v1  ;;  %1754 = vmatprep.mubr.msk.bf16.mxu1 %vm1995_vm0, %v1994_v1 }
  0x25   : > { %1804 = vmatprep.subr.bf16.mxu0 %v1994_v1  ;;  %1870 = vmatprep.subr.bf16.mxu1 %v1994_v1 }
  0x27   : > { %1805 = vmatpush3.bf16.msra.mxu0 %v1964_v20  ;;  %1871 = vmatpush3.bf16.msra.mxu1 %v1965_v21 }
  0x28   : > { %1806 = vmatprep.subr.bf16.mxu0 %v1994_v1  ;;  %1872 = vmatprep.subr.bf16.mxu1 %v1994_v1 }
  0x2a   : > { %1689 = vmatmul.mubr.msk.bf16.gmra.mrb[4].mxu0 %vm361_vm2, %v2123_v22  ;;  %1755 = vmatmul.mubr.msk.bf16.gmra.mrb[4].mxu1 %vm361_vm2, %v2123_v22 }
  0x2b   : > { %1692 = vmatprep.mubr.msk.bf16.mxu0 %vm1995_vm0, %v1994_v1  ;;  %1758 = vmatprep.mubr.msk.bf16.mxu1 %vm1995_vm0, %v1994_v1 }
  0x2c   : > { %1807 = vmatpush3.bf16.msra.mxu0 %v1967_v23  ;;  %1873 = vmatpush3.bf16.msra.mxu1 %v1969_v24 }
  0x2d   : > { %1808 = vmatprep.subr.bf16.mxu0 %v1994_v1  ;;  %1874 = vmatprep.subr.bf16.mxu1 %v1994_v1 }
  0x30   : > { %1809 = vmatpush3.bf16.msra.mxu0 %v1971_v25  ;;  %1875 = vmatpush3.bf16.msra.mxu1 %v1973_v26 }
  0x31   : > { %1810 = vmatprep.subr.bf16.mxu0 %v1994_v1  ;;  %1876 = vmatprep.subr.bf16.mxu1 %v1994_v1 }
  0x32   : > { %1693 = vmatmul.mubr.msk.bf16.gmra.mrb[8].mxu0 %vm361_vm2, %v2150_v27  ;;  %1759 = vmatmul.mubr.msk.bf16.gmra.mrb[8].mxu1 %vm361_vm2, %v2150_v27 }
  0x33   : > { %1696 = vmatprep.mubr.msk.bf16.mxu0 %vm1995_vm0, %v1994_v1  ;;  %1762 = vmatprep.mubr.msk.bf16.mxu1 %vm1995_vm0, %v1994_v1 }
  0x34   : > { %1811 = vmatpush3.bf16.msra.mxu0 %v1975_v28  ;;  %1877 = vmatpush3.bf16.msra.mxu1 %v1976_v29 }
  0x35   : > { %1812 = vmatprep.subr.bf16.mxu0 %v1994_v1  ;;  %1878 = vmatprep.subr.bf16.mxu1 %v1994_v1 }
  0x38   : > { %1813 = vmatpush3.bf16.msra.mxu0 %v1979_v30  ;;  %1879 = vmatpush3.bf16.msra.mxu1 %v1980_v31 }
  0x39   : > { %1814 = vmatprep.subr.bf16.mxu0 %v1994_v1  ;;  %1880 = vmatprep.subr.bf16.mxu1 %v1994_v1 }
  0x3a   : > { %1697 = vmatmul.mubr.msk.bf16.gmra.mrb[12].mxu0 %vm361_vm2, %v2180_v33  ;;  %1763 = vmatmul.mubr.msk.bf16.gmra.mrb[12].mxu1 %vm361_vm2, %v2180_v33 }
  0x3b   : > { %1700 = vmatprep.mubr.msk.bf16.mxu0 %vm1995_vm0, %v1994_v1  ;;  %1766 = vmatprep.mubr.msk.bf16.mxu1 %vm1995_vm0, %v1994_v1 }
  0x3c   : > { %1815 = vmatpush3.bf16.msra.mxu0 %v788_v35  ;;  %1881 = vmatpush3.bf16.msra.mxu1 %v993_v36 }
  0x42   : > { %1701 = vmatmul.mubr.msk.bf16.gmra.mrb[16].mxu0 %vm361_vm2, %v1968_v37  ;;  %1767 = vmatmul.mubr.msk.bf16.gmra.mrb[16].mxu1 %vm361_vm2, %v1968_v37 }
  0x43   : > { %1704 = vmatprep.mubr.msk.bf16.mxu0 %vm1995_vm0, %v1994_v1  ;;  %1770 = vmatprep.mubr.msk.bf16.mxu1 %vm1995_vm0, %v1994_v1 }
  0x4a   : > { %1705 = vmatmul.mubr.msk.bf16.gmra.mrb[20].mxu0 %vm361_vm2, %v1970_v38  ;;  %1771 = vmatmul.mubr.msk.bf16.gmra.mrb[20].mxu1 %vm361_vm2, %v1970_v38 }
  0x4b   : > { %1708 = vmatprep.mubr.msk.bf16.mxu0 %vm1995_vm0, %v1994_v1  ;;  %1774 = vmatprep.mubr.msk.bf16.mxu1 %vm1995_vm0, %v1994_v1 }
  0x52   : > { %1709 = vmatmul.mubr.msk.bf16.gmra.mrb[24].mxu0 %vm361_vm2, %v1972_v39  ;;  %1775 = vmatmul.mubr.msk.bf16.gmra.mrb[24].mxu1 %vm361_vm2, %v1972_v39 }
  0x53   : > { %1712 = vmatprep.mubr.msk.bf16.mxu0 %vm1995_vm0, %v1994_v1  ;;  %1778 = vmatprep.mubr.msk.bf16.mxu1 %vm1995_vm0, %v1994_v1 }
  0x5a   : > { %1713 = vmatmul.mubr.msk.bf16.gmra.mrb[28].mxu0 %vm361_vm2, %v1974_v40  ;;  %1779 = vmatmul.mubr.msk.bf16.gmra.mrb[28].mxu1 %vm361_vm2, %v1974_v40 }
  0x5b   : > { %1716 = vmatprep.mubr.msk.bf16.mxu0 %vm1995_vm0, %v1994_v1  ;;  %1782 = vmatprep.mubr.msk.bf16.mxu1 %vm1995_vm0, %v1994_v1 }
  0x62   : > { %1717 = vmatmul.mubr.msk.bf16.gmra.mrb[32].mxu0 %vm361_vm2, %v1977_v41  ;;  %1783 = vmatmul.mubr.msk.bf16.gmra.mrb[32].mxu1 %vm361_vm2, %v1977_v41 }
  0x63   : > { %1720 = vmatprep.mubr.msk.bf16.mxu0 %vm1995_vm0, %v1994_v1  ;;  %1786 = vmatprep.mubr.msk.bf16.mxu1 %vm1995_vm0, %v1994_v1 }
  0x6a   : > { %1721 = vmatmul.mubr.msk.bf16.gmra.mrb[36].mxu0 %vm361_vm2, %v1978_v42  ;;  %1787 = vmatmul.mubr.msk.bf16.gmra.mrb[36].mxu1 %vm361_vm2, %v1978_v42 }
  0x6b   : > { %1724 = vmatprep.mubr.msk.bf16.mxu0 %vm1995_vm0, %v1994_v1  ;;  %1790 = vmatprep.mubr.msk.bf16.mxu1 %vm1995_vm0, %v1994_v1 }
  0x72   : > { %1725 = vmatmul.mubr.msk.bf16.gmra.mrb[40].mxu0 %vm361_vm2, %v1981_v43  ;;  %1791 = vmatmul.mubr.msk.bf16.gmra.mrb[40].mxu1 %vm361_vm2, %v1981_v43 }
  0x73   : > { %1728 = vmatprep.mubr.msk.bf16.mxu0 %vm1995_vm0, %v1994_v1  ;;  %1794 = vmatprep.mubr.msk.bf16.mxu1 %vm1995_vm0, %v1994_v1 }
  0x7a   : > { %1729 = vmatmul.mubr.msk.bf16.gmra.mrb[44].mxu0 %vm361_vm2, %v1982_v44  ;;  %1795 = vmatmul.mubr.msk.bf16.gmra.mrb[44].mxu1 %vm361_vm2, %v1982_v44 }
  0x7b   : > { %1732 = vmatprep.mubr.msk.bf16.mxu0 %vm1995_vm0, %v1994_v1  ;;  %1798 = vmatprep.mubr.msk.bf16.mxu1 %vm1995_vm0, %v1994_v1 }
  0x82   : > { %1733 = vmatmul.mubr.msk.bf16.gmra.mrb[48].mxu0 %vm361_vm2, %v1985_v45  ;;  %1799 = vmatmul.mubr.msk.bf16.gmra.mrb[48].mxu1 %vm361_vm2, %v1985_v45 }
  0x83   : > { %1816 = vmatprep.mubr.msk.bf16.mxu0 %vm1995_vm0, %v1994_v1  ;;  %1882 = vmatprep.mubr.msk.bf16.mxu1 %vm1995_vm0, %v1994_v1 }
  0x8a   : > { %1817 = vmatmul.mubr.msk.bf16.vlgmr.msra.gmra.mrb[52].mxu0 %vm361_vm2, %v2097_v17  ;;  %1883 = vmatmul.mubr.msk.bf16.vlgmr.msra.gmra.mrb[52].mxu1 %vm361_vm2, %v2097_v17 }
  0x8b   : > { %1820 = vmatprep.mubr.msk.bf16.mxu0 %vm1995_vm0, %v1994_v1  ;;  %1886 = vmatprep.mubr.msk.bf16.mxu1 %vm1995_vm0, %v1994_v1 }
  0x92   : > { %1821 = vmatmul.mubr.msk.bf16.gmra.mrb[56].mxu0 %vm361_vm2, %v2123_v22  ;;  %1887 = vmatmul.mubr.msk.bf16.gmra.mrb[56].mxu1 %vm361_vm2, %v2123_v22 }
  0x93   : > { %1824 = vmatprep.mubr.msk.bf16.mxu0 %vm1995_vm0, %v1994_v1  ;;  %1890 = vmatprep.mubr.msk.bf16.mxu1 %vm1995_vm0, %v1994_v1 }
  0x9a   : > { %1825 = vmatmul.mubr.msk.bf16.gmra.mrb[60].mxu0 %vm361_vm2, %v2150_v27  ;;  %1891 = vmatmul.mubr.msk.bf16.gmra.mrb[60].mxu1 %vm361_vm2, %v2150_v27 }
  0x9b   : > { %1828 = vmatprep.mubr.msk.bf16.mxu0 %vm1995_vm0, %v1994_v1  ;;  %1894 = vmatprep.mubr.msk.bf16.mxu1 %vm1995_vm0, %v1994_v1 }
  0xa2   : > { %1829 = vmatmul.mubr.msk.bf16.gmra.mrb[64].mxu0 %vm361_vm2, %v2180_v33  ;;  %1895 = vmatmul.mubr.msk.bf16.gmra.mrb[64].mxu1 %vm361_vm2, %v2180_v33 }
  0xa3   : > { %1832 = vmatprep.mubr.msk.bf16.mxu0 %vm1995_vm0, %v1994_v1  ;;  %1898 = vmatprep.mubr.msk.bf16.mxu1 %vm1995_vm0, %v1994_v1 }
  0xaa   : > { %1833 = vmatmul.mubr.msk.bf16.gmra.mrb[68].mxu0 %vm361_vm2, %v1968_v37  ;;  %1899 = vmatmul.mubr.msk.bf16.gmra.mrb[68].mxu1 %vm361_vm2, %v1968_v37 }
  0xab   : > { %1836 = vmatprep.mubr.msk.bf16.mxu0 %vm1995_vm0, %v1994_v1  ;;  %1902 = vmatprep.mubr.msk.bf16.mxu1 %vm1995_vm0, %v1994_v1 }
  0xb2   : > { %1837 = vmatmul.mubr.msk.bf16.gmra.mrb[72].mxu0 %vm361_vm2, %v1970_v38  ;;  %1903 = vmatmul.mubr.msk.bf16.gmra.mrb[72].mxu1 %vm361_vm2, %v1970_v38 }
  0xb3   : > { %1840 = vmatprep.mubr.msk.bf16.mxu0 %vm1995_vm0, %v1994_v1  ;;  %1906 = vmatprep.mubr.msk.bf16.mxu1 %vm1995_vm0, %v1994_v1 }
  0xba   : > { %1841 = vmatmul.mubr.msk.bf16.gmra.mrb[76].mxu0 %vm361_vm2, %v1972_v39  ;;  %1907 = vmatmul.mubr.msk.bf16.gmra.mrb[76].mxu1 %vm361_vm2, %v1972_v39 }
  0xbb   : > { %1844 = vmatprep.mubr.msk.bf16.mxu0 %vm1995_vm0, %v1994_v1  ;;  %1910 = vmatprep.mubr.msk.bf16.mxu1 %vm1995_vm0, %v1994_v1 }
  0xc2   : > { %1845 = vmatmul.mubr.msk.bf16.gmra.mrb[80].mxu0 %vm361_vm2, %v1974_v40  ;;  %1911 = vmatmul.mubr.msk.bf16.gmra.mrb[80].mxu1 %vm361_vm2, %v1974_v40 }
  0xc3   : > { %1848 = vmatprep.mubr.msk.bf16.mxu0 %vm1995_vm0, %v1994_v1  ;;  %1914 = vmatprep.mubr.msk.bf16.mxu1 %vm1995_vm0, %v1994_v1 }
  0xca   : > { %1849 = vmatmul.mubr.msk.bf16.gmra.mrb[84].mxu0 %vm361_vm2, %v1977_v41  ;;  %1915 = vmatmul.mubr.msk.bf16.gmra.mrb[84].mxu1 %vm361_vm2, %v1977_v41 }
  0xcb   : > { %1852 = vmatprep.mubr.msk.bf16.mxu0 %vm1995_vm0, %v1994_v1  ;;  %1918 = vmatprep.mubr.msk.bf16.mxu1 %vm1995_vm0, %v1994_v1 }
  0xd2   : > { %1853 = vmatmul.mubr.msk.bf16.gmra.mrb[88].mxu0 %vm361_vm2, %v1978_v42  ;;  %1919 = vmatmul.mubr.msk.bf16.gmra.mrb[88].mxu1 %vm361_vm2, %v1978_v42 }
  0xd3   : > { %1856 = vmatprep.mubr.msk.bf16.mxu0 %vm1995_vm0, %v1994_v1  ;;  %1922 = vmatprep.mubr.msk.bf16.mxu1 %vm1995_vm0, %v1994_v1 }
  0xda   : > { %1857 = vmatmul.mubr.msk.bf16.gmra.mrb[92].mxu0 %vm361_vm2, %v1981_v43  ;;  %1923 = vmatmul.mubr.msk.bf16.gmra.mrb[92].mxu1 %vm361_vm2, %v1981_v43 }
  0xdb   : > { %1860 = vmatprep.mubr.msk.bf16.mxu0 %vm1995_vm0, %v1994_v1  ;;  %1926 = vmatprep.mubr.msk.bf16.mxu1 %vm1995_vm0, %v1994_v1 }
  0xe2   : > { %1861 = vmatmul.mubr.msk.bf16.gmra.mrb[96].mxu0 %vm361_vm2, %v1982_v44  ;;  %1927 = vmatmul.mubr.msk.bf16.gmra.mrb[96].mxu1 %vm361_vm2, %v1982_v44 }
  0xe3   : > { %1864 = vmatprep.mubr.msk.bf16.mxu0 %vm1995_vm0, %v1994_v1  ;;  %1930 = vmatprep.mubr.msk.bf16.mxu1 %vm1995_vm0, %v1994_v1 }
  0xea   : > { %1865 = vmatmul.mubr.msk.bf16.gmra.mrb[100].mxu0 %vm361_vm2, %v1985_v45  ;;  %1931 = vmatmul.mubr.msk.bf16.gmra.mrb[100].mxu1 %vm361_vm2, %v1985_v45 }
  0xf5   : > { %v2343_v46 = vpop.f32.mrb[0].mxu0  ;;  %v2345_v47 = vpop.f32.mrb[0].mxu1 }
  0xf6   : > { %v1686_v48 = vpop.f32.mrb[1].mxu0  ;;  %v721_v49 = vmax.f32 %v2343_v46, %v2345_v47  ;;  %v1752_v50 = vpop.f32.mrb[1].mxu1 }
  0xf7   : > { %v2349_v51 = vpop.f32.mrb[2].mxu0  ;;  %v2351_v52 = vpop.f32.mrb[2].mxu1 }
  0xf8   : > { %v1687_v53 = vpop.f32.mrb[3].mxu0  ;;  %v722_v54 = vmax.f32 %v2349_v51, %v2351_v52  ;;  %v1753_v55 = vpop.f32.mrb[3].mxu1 }
  0xfd   : > { %v2355_v56 = vpop.f32.mrb[4].mxu0  ;;  %v2357_v57 = vpop.f32.mrb[4].mxu1 }
  0xfe   : > { %v1690_v58 = vpop.f32.mrb[5].mxu0  ;;  %v1756_v60 = vpop.f32.mrb[5].mxu1 }
  0xff   : > { %v2361_v61 = vpop.f32.mrb[6].mxu0  ;;  %v2363_v62 = vpop.f32.mrb[6].mxu1 }
 0x100   : > { %v1691_v63 = vpop.f32.mrb[7].mxu0  ;;  %v1757_v1 = vpop.f32.mrb[7].mxu1 }
 0x105   : > { %v2367_v2 = vpop.f32.mrb[8].mxu0  ;;  %v2369_v3 = vpop.f32.mrb[8].mxu1 }
 0x106   : > { %v1694_v4 = vpop.f32.mrb[9].mxu0  ;;  %v1760_v6 = vpop.f32.mrb[9].mxu1 }
 0x107   : > { %v2373_v7 = vpop.f32.mrb[10].mxu0  ;;  %v2375_v8 = vpop.f32.mrb[10].mxu1 }
 0x108   : > { %v1695_v9 = vpop.f32.mrb[11].mxu0  ;;  %v1761_v11 = vpop.f32.mrb[11].mxu1 }
 0x10d   : > { %v2379_v12 = vpop.f32.mrb[12].mxu0  ;;  %v2381_v13 = vpop.f32.mrb[12].mxu1 }
 0x10e   : > { %v1698_v14 = vpop.f32.mrb[13].mxu0  ;;  %v1764_v16 = vpop.f32.mrb[13].mxu1 }
 0x10f   : > { %v2385_v17 = vpop.f32.mrb[14].mxu0  ;;  %v2387_v18 = vpop.f32.mrb[14].mxu1 }
 0x110   : > { %v1699_v19 = vpop.f32.mrb[15].mxu0  ;;  %v1765_v21 = vpop.f32.mrb[15].mxu1 }
 0x115   : > { %v2391_v22 = vpop.f32.mrb[16].mxu0  ;;  %v2393_v23 = vpop.f32.mrb[16].mxu1 }
 0x116   : > { %v1702_v24 = vpop.f32.mrb[17].mxu0  ;;  %v1768_v26 = vpop.f32.mrb[17].mxu1 }
 0x117   : > { %v2397_v27 = vpop.f32.mrb[18].mxu0  ;;  %v2399_v28 = vpop.f32.mrb[18].mxu1 }
 0x118   : > { %v1703_v29 = vpop.f32.mrb[19].mxu0  ;;  %v1769_v31 = vpop.f32.mrb[19].mxu1 }
 0x11d   : > { %v2403_v32 = vpop.f32.mrb[20].mxu0  ;;  %v2405_v33 = vpop.f32.mrb[20].mxu1 }
 0x11e   : > { %v1706_v34 = vpop.f32.mrb[21].mxu0  ;;  %v1772_v36 = vpop.f32.mrb[21].mxu1 }
 0x11f   : > { %v2409_v37 = vpop.f32.mrb[22].mxu0  ;;  %v2411_v38 = vpop.f32.mrb[22].mxu1 }
 0x120   : > { %v1707_v39 = vpop.f32.mrb[23].mxu0  ;;  %v1773_v41 = vpop.f32.mrb[23].mxu1 }
 0x125   : > { %v2415_v42 = vpop.f32.mrb[24].mxu0  ;;  %v2417_v43 = vpop.f32.mrb[24].mxu1 }
 0x126   : > { %v1710_v44 = vpop.f32.mrb[25].mxu0  ;;  %v1776_v48 = vpop.f32.mrb[25].mxu1 }
 0x127   : > { %v2421_v50 = vpop.f32.mrb[26].mxu0  ;;  %v2423_v53 = vpop.f32.mrb[26].mxu1 }
 0x128   : > { %v1711_v55 = vpop.f32.mrb[27].mxu0  ;;  %v1777_v60 = vpop.f32.mrb[27].mxu1 }
 0x12d   : > { %v2427_v63 = vpop.f32.mrb[28].mxu0  ;;  %v2429_v1 = vpop.f32.mrb[28].mxu1 }
 0x12e   : > { %v1714_v4 = vpop.f32.mrb[29].mxu0  ;;  %v1780_v9 = vpop.f32.mrb[29].mxu1 }
 0x12f   : > { %v2433_v11 = vpop.f32.mrb[30].mxu0  ;;  %v2435_v14 = vpop.f32.mrb[30].mxu1 }
 0x130   : > { %v1715_v16 = vpop.f32.mrb[31].mxu0  ;;  %v1781_v21 = vpop.f32.mrb[31].mxu1 }
 0x135   : > { %v2439_v24 = vpop.f32.mrb[32].mxu0  ;;  %v2441_v26 = vpop.f32.mrb[32].mxu1 }
 0x136   : > { %v1718_v29 = vpop.f32.mrb[33].mxu0  ;;  %v1784_v34 = vpop.f32.mrb[33].mxu1 }
 0x137   : > { %v2445_v36 = vpop.f32.mrb[34].mxu0  ;;  %v2447_v39 = vpop.f32.mrb[34].mxu1 }
 0x138   : > { %v1719_v41 = vpop.f32.mrb[35].mxu0  ;;  %v1785_v48 = vpop.f32.mrb[35].mxu1 }
 0x13d   : > { %v2451_v55 = vpop.f32.mrb[36].mxu0  ;;  %v2453_v60 = vpop.f32.mrb[36].mxu1 }
 0x13e   : > { %v1722_v4 = vpop.f32.mrb[37].mxu0  ;;  %v1788_v16 = vpop.f32.mrb[37].mxu1 }
 0x13f   : > { %v2457_v21 = vpop.f32.mrb[38].mxu0  ;;  %v2459_v29 = vpop.f32.mrb[38].mxu1 }
 0x140   : > { %v1723_v34 = vpop.f32.mrb[39].mxu0  ;;  %v1789_v31 = vpop.f32.mrb[39].mxu1 }
 0x145   : > { %v2463_v44 = vpop.f32.mrb[40].mxu0  ;;  %v2465_v48 = vpop.f32.mrb[40].mxu1 }
 0x146   : > { %v1726_v19 = vpop.f32.mrb[41].mxu0  ;;  %v1792_v6 = vpop.f32.mrb[41].mxu1 }
 0x147   : > { %v2469_v9 = vpop.f32.mrb[42].mxu0  ;;  %v2471_v16 = vpop.f32.mrb[42].mxu1 }
 0x148   : > { %v1727_v58 = vpop.f32.mrb[43].mxu0  ;;  %v1793_v45 = vpop.f32.mrb[43].mxu1 }
 0x14d   : > { %v2475_v41 = vpop.f32.mrb[44].mxu0  ;;  %v2477_v31 = vpop.f32.mrb[44].mxu1 }
 0x14e   : > { %v1730_v40 = vpop.f32.mrb[45].mxu0  ;;  %v1796_v35 = vpop.f32.mrb[45].mxu1 }
 0x14f   : > { %v2481_v4 = vpop.f32.mrb[46].mxu0  ;;  %v2483_v6 = vpop.f32.mrb[46].mxu1 }
 0x150   : > { %v1731_v30 = vpop.f32.mrb[47].mxu0  ;;  %v1797_v25 = vpop.f32.mrb[47].mxu1 }
 0x155   : > { %v2487_v34 = vpop.f32.mrb[48].mxu0  ;;  %v2489_v45 = vpop.f32.mrb[48].mxu1 }
 0x156   : > { %v1734_v20 = vpop.f32.mrb[49].mxu0  ;;  %v1800_v15 = vpop.f32.mrb[49].mxu1 }
 0x157   : > { %v538_v19 = vpop.f32.mrb[50].mxu0  ;;  %v718_v35 = vpop.f32.mrb[50].mxu1  ;;  %v2499_v20 = vld [vmem:[%s2659_s2] ss:$0 sm:$0xff] }
 0x158   : > { %v1735_v10 = vpop.f32.mrb[51].mxu0  ;;  %v1801_v5 = vpop.f32.mrb[51].mxu1 }
 0x15d   : > { %v824_v0 = vpop.f32.mrb[52].mxu0  ;;  %v1029_v25 = vpop.f32.mrb[52].mxu1 }
 0x15e   : > { %v926_v30 = vmax.f32 %v721_v49, %v824_v0  ;;  %v1818_v58 = vpop.f32.mrb[53].mxu0  ;;  %v1884_v59 = vpop.f32.mrb[53].mxu1 }
 0x15f   : > { %v827_v40 = vpop.f32.mrb[54].mxu0  ;;  %v1032_v10 = vpop.f32.mrb[54].mxu1  ;;  %v2661_v59 = vmax.f32 %v2355_v56, %v2357_v57 }
 0x160   : > { %v1131_v15 = vmax.f32 %v926_v30, %v1029_v25  ;;  %v927_v5 = vmax.f32 %v722_v54, %v827_v40  ;;  %v1819_v19 = vpop.f32.mrb[55].mxu0  ;;  %v1885_v35 = vpop.f32.mrb[55].mxu1 }
 0x161   : > { %v2662_v19 = vmax.f32 %v2361_v61, %v2363_v62  ;;  %v2663_v61 = vmax.f32 %v2367_v2, %v2369_v3 }
 0x162   : > { %v1162_v46 = vadd.f32 %v2499_v20, %v1131_v15  ;;  %v1132_v47 = vmax.f32 %v927_v5, %v1032_v10 }
 0x164   : > { %v1187_v49 = vmax.f32 %v1162_v46, 0.0  ;;  %v1163_v0 = vadd.f32 %v2499_v20, %v1132_v47 }
 0x165   : > { %v832_v51 = vpop.f32.mrb[56].mxu0  ;;  %v1037_v40 = vpop.f32.mrb[56].mxu1 }
 0x166   : > { %v1565_v52 = vpack.c.bf16 %v1187_v49, %v1187_v49  ;;  %v1188_v54 = vmax.f32 %v1163_v0, 0.0  ;;  %v928_v58 = vmax.f32 %v2661_v59, %v832_v51  ;;  %v1822_v30 = vpop.f32.mrb[57].mxu0  ;;  %v1888_v25 = vpop.f32.mrb[57].mxu1 }
 0x167   : > { %v835_v15 = vpop.f32.mrb[58].mxu0  ;;  %v1040_v46 = vpop.f32.mrb[58].mxu1 }
 0x168   : > { %1314 = vst.msk [vmem:[%s2511_s30] sm:$0xf] %vm1313_vm3, %v1565_v52  ;;  %v1566_v5 = vpack.c.bf16 %v1188_v54, %v1188_v54  ;;  %v1133_v10 = vmax.f32 %v928_v58, %v1037_v40  ;;  %v929_v35 = vmax.f32 %v2662_v19, %v835_v15  ;;  %v1823_v47 = vpop.f32.mrb[59].mxu0  ;;  %v1889_v49 = vpop.f32.mrb[59].mxu1 }
 0x16a   : > { %1315 = vst.msk [vmem:[%s2511_s30 + $0x4] sm:$0xf] %vm1313_vm3, %v1566_v5  ;;  %v1164_v56 = vadd.f32 %v2499_v20, %v1133_v10  ;;  %v1134_v57 = vmax.f32 %v929_v35, %v1040_v46  ;;  %v2664_v10 = vmax.f32 %v2373_v7, %v2375_v8  ;;  %v2665_v7 = vmax.f32 %v2379_v12, %v2381_v13 }
 0x16c   : > { %v1189_v0 = vmax.f32 %v1164_v56, 0.0  ;;  %v1165_v51 = vadd.f32 %v2499_v20, %v1134_v57 }
 0x16d   : > { %v840_v52 = vpop.f32.mrb[60].mxu0  ;;  %v1045_v58 = vpop.f32.mrb[60].mxu1 }
 0x16e   : > { %v1567_v54 = vpack.c.bf16 %v1189_v0, %v1189_v0  ;;  %v1190_v59 = vmax.f32 %v1165_v51, 0.0  ;;  %v930_v62 = vmax.f32 %v2663_v61, %v840_v52  ;;  %v1826_v40 = vpop.f32.mrb[61].mxu0  ;;  %v1892_v30 = vpop.f32.mrb[61].mxu1 }
 0x16f   : > { %v843_v25 = vpop.f32.mrb[62].mxu0  ;;  %v1048_v35 = vpop.f32.mrb[62].mxu1  ;;  %v2666_v40 = vmax.f32 %v2385_v17, %v2387_v18  ;;  %v2667_v17 = vmax.f32 %v2391_v22, %v2393_v23 }
 0x170   : > { %1316 = vst.msk [vmem:[%s2511_s30 + $0x8] sm:$0xf] %vm1313_vm3, %v1567_v54  ;;  %v1568_v15 = vpack.c.bf16 %v1190_v59, %v1190_v59  ;;  %v1135_v5 = vmax.f32 %v930_v62, %v1045_v58  ;;  %v931_v19 = vmax.f32 %v2664_v10, %v843_v25  ;;  %v1827_v46 = vpop.f32.mrb[63].mxu0  ;;  %v1893_v47 = vpop.f32.mrb[63].mxu1 }
 0x172   : > { %1317 = vst.msk [vmem:[%s2511_s30 + $0xc] sm:$0xf] %vm1313_vm3, %v1568_v15  ;;  %v1166_v2 = vadd.f32 %v2499_v20, %v1135_v5  ;;  %v1136_v3 = vmax.f32 %v931_v19, %v1048_v35 }
 0x174   : > { %v1191_v49 = vmax.f32 %v1166_v2, 0.0  ;;  %v1167_v56 = vadd.f32 %v2499_v20, %v1136_v3 }
 0x175   : > { %v848_v57 = vpop.f32.mrb[64].mxu0  ;;  %v1053_v52 = vpop.f32.mrb[64].mxu1 }
 0x176   : > { %v1569_v0 = vpack.c.bf16 %v1191_v49, %v1191_v49  ;;  %v1192_v51 = vmax.f32 %v1167_v56, 0.0  ;;  %v932_v8 = vmax.f32 %v2665_v7, %v848_v57  ;;  %v1830_v54 = vpop.f32.mrb[65].mxu0  ;;  %v1896_v59 = vpop.f32.mrb[65].mxu1 }
 0x177   : > { %v851_v61 = vpop.f32.mrb[66].mxu0  ;;  %v1056_v25 = vpop.f32.mrb[66].mxu1 }
 0x178   : > { %1318 = vst.msk [vmem:[%s2511_s30 + $0x10] sm:$0xf] %vm1313_vm3, %v1569_v0  ;;  %v1570_v62 = vpack.c.bf16 %v1192_v51, %v1192_v51  ;;  %v1137_v58 = vmax.f32 %v932_v8, %v1053_v52  ;;  %v933_v30 = vmax.f32 %v2666_v40, %v851_v61  ;;  %v1831_v15 = vpop.f32.mrb[67].mxu0  ;;  %v1897_v5 = vpop.f32.mrb[67].mxu1  ;;  %v2668_v51 = vmax.f32 %v2397_v27, %v2399_v28 }
 0x179   : > { %v2669_v27 = vmax.f32 %v2403_v32, %v2405_v33 }
 0x17a   : > { %1319 = vst.msk [vmem:[%s2511_s30 + $0x14] sm:$0xf] %vm1313_vm3, %v1570_v62  ;;  %v1168_v12 = vadd.f32 %v2499_v20, %v1137_v58  ;;  %v1138_v13 = vmax.f32 %v933_v30, %v1056_v25 }
 0x17c   : > { %v1193_v10 = vmax.f32 %v1168_v12, 0.0  ;;  %v1169_v19 = vadd.f32 %v2499_v20, %v1138_v13 }
 0x17d   : > { %v856_v35 = vpop.f32.mrb[68].mxu0  ;;  %v1061_v2 = vpop.f32.mrb[68].mxu1 }
 0x17e   : > { %v1571_v46 = vpack.c.bf16 %v1193_v10, %v1193_v10  ;;  %v1194_v47 = vmax.f32 %v1169_v19, 0.0  ;;  %v934_v18 = vmax.f32 %v2667_v17, %v856_v35  ;;  %v1834_v3 = vpop.f32.mrb[69].mxu0  ;;  %v1900_v49 = vpop.f32.mrb[69].mxu1  ;;  %v2670_v10 = vmax.f32 %v2409_v37, %v2411_v38 }
 0x17f   : > { %v859_v56 = vpop.f32.mrb[70].mxu0  ;;  %v1064_v8 = vpop.f32.mrb[70].mxu1  ;;  %v2671_v37 = vmax.f32 %v2415_v42, %v2417_v43 }
 0x180   : > { %1320 = vst.msk [vmem:[%s2511_s30 + $0x18] sm:$0xf] %vm1313_vm3, %v1571_v46  ;;  %v1572_v57 = vpack.c.bf16 %v1194_v47, %v1194_v47  ;;  %v1139_v0 = vmax.f32 %v934_v18, %v1061_v2  ;;  %v935_v7 = vmax.f32 %v2668_v51, %v859_v56  ;;  %v1835_v52 = vpop.f32.mrb[71].mxu0  ;;  %v1901_v54 = vpop.f32.mrb[71].mxu1 }
 0x181   : > { %v2672_v52 = vmax.f32 %v2421_v50, %v2423_v53  ;;  %v2673_v50 = vmax.f32 %v2427_v63, %v2429_v1 }
 0x182   : > { %1321 = vst.msk [vmem:[%s2511_s30 + $0x1c] sm:$0xf] %vm1313_vm3, %v1572_v57  ;;  %v1170_v22 = vadd.f32 %v2499_v20, %v1139_v0  ;;  %v1140_v23 = vmax.f32 %v935_v7, %v1064_v8 }
 0x184   : > { %v1195_v59 = vmax.f32 %v1170_v22, 0.0  ;;  %v1171_v61 = vadd.f32 %v2499_v20, %v1140_v23 }
 0x185   : > { %v864_v62 = vpop.f32.mrb[72].mxu0  ;;  %v1069_v30 = vpop.f32.mrb[72].mxu1 }
 0x186   : > { %v1573_v58 = vpack.c.bf16 %v1195_v59, %v1195_v59  ;;  %v1196_v40 = vmax.f32 %v1171_v61, 0.0  ;;  %v936_v28 = vmax.f32 %v2669_v27, %v864_v62  ;;  %v1838_v25 = vpop.f32.mrb[73].mxu0  ;;  %v1904_v15 = vpop.f32.mrb[73].mxu1 }
 0x187   : > { %v867_v5 = vpop.f32.mrb[74].mxu0  ;;  %v1072_v35 = vpop.f32.mrb[74].mxu1 }
 0x188   : > { %1322 = vst.msk [vmem:[%s2511_s30 + $0x20] sm:$0xf] %vm1313_vm3, %v1573_v58  ;;  %v1574_v12 = vpack.c.bf16 %v1196_v40, %v1196_v40  ;;  %v1141_v13 = vmax.f32 %v936_v28, %v1069_v30  ;;  %v937_v19 = vmax.f32 %v2670_v10, %v867_v5  ;;  %v1839_v46 = vpop.f32.mrb[75].mxu0  ;;  %v1905_v47 = vpop.f32.mrb[75].mxu1 }
 0x18a   : > { %1323 = vst.msk [vmem:[%s2511_s30 + $0x24] sm:$0xf] %vm1313_vm3, %v1574_v12  ;;  %v1172_v32 = vadd.f32 %v2499_v20, %v1141_v13  ;;  %v1142_v33 = vmax.f32 %v937_v19, %v1072_v35  ;;  %v2674_v13 = vmax.f32 %v2433_v11, %v2435_v14  ;;  %v2675_v11 = vmax.f32 %v2439_v24, %v2441_v26 }
 0x18c   : > { %v1197_v17 = vmax.f32 %v1172_v32, 0.0  ;;  %v1173_v18 = vadd.f32 %v2499_v20, %v1142_v33 }
 0x18d   : > { %v872_v2 = vpop.f32.mrb[76].mxu0  ;;  %v1077_v56 = vpop.f32.mrb[76].mxu1 }
 0x18e   : > { %v1575_v3 = vpack.c.bf16 %v1197_v17, %v1197_v17  ;;  %v1198_v49 = vmax.f32 %v1173_v18, 0.0  ;;  %v938_v38 = vmax.f32 %v2671_v37, %v872_v2  ;;  %v1842_v57 = vpop.f32.mrb[77].mxu0  ;;  %v1908_v0 = vpop.f32.mrb[77].mxu1 }
 0x18f   : > { %v875_v51 = vpop.f32.mrb[78].mxu0  ;;  %v1080_v22 = vpop.f32.mrb[78].mxu1  ;;  %v2676_v57 = vmax.f32 %v2445_v36, %v2447_v39  ;;  %v2677_v36 = vmax.f32 %v2451_v55, %v2453_v60 }
 0x190   : > { %1324 = vst.msk [vmem:[%s2511_s30 + $0x28] sm:$0xf] %vm1313_vm3, %v1575_v3  ;;  %v1576_v7 = vpack.c.bf16 %v1198_v49, %v1198_v49  ;;  %v1143_v8 = vmax.f32 %v938_v38, %v1077_v56  ;;  %v939_v54 = vmax.f32 %v2672_v52, %v875_v51  ;;  %v1843_v23 = vpop.f32.mrb[79].mxu0  ;;  %v1909_v59 = vpop.f32.mrb[79].mxu1 }
 0x192   : > { %1325 = vst.msk [vmem:[%s2511_s30 + $0x2c] sm:$0xf] %vm1313_vm3, %v1576_v7  ;;  %v1174_v42 = vadd.f32 %v2499_v20, %v1143_v8  ;;  %v1144_v43 = vmax.f32 %v939_v54, %v1080_v22 }
 0x194   : > { %v1199_v61 = vmax.f32 %v1174_v42, 0.0  ;;  %v1175_v62 = vadd.f32 %v2499_v20, %v1144_v43 }
 0x195   : > { %v880_v58 = vpop.f32.mrb[80].mxu0  ;;  %v1085_v28 = vpop.f32.mrb[80].mxu1 }
 0x196   : > { %v1577_v40 = vpack.c.bf16 %v1199_v61, %v1199_v61  ;;  %v1200_v27 = vmax.f32 %v1175_v62, 0.0  ;;  %v940_v53 = vmax.f32 %v2673_v50, %v880_v58  ;;  %v1846_v30 = vpop.f32.mrb[81].mxu0  ;;  %v1912_v25 = vpop.f32.mrb[81].mxu1 }
 0x197   : > { %v883_v15 = vpop.f32.mrb[82].mxu0  ;;  %v1088_v19 = vpop.f32.mrb[82].mxu1 }
 0x198   : > { %1326 = vst.msk [vmem:[%s2511_s30 + $0x30] sm:$0xf] %vm1313_vm3, %v1577_v40  ;;  %v1578_v5 = vpack.c.bf16 %v1200_v27, %v1200_v27  ;;  %v1145_v12 = vmax.f32 %v940_v53, %v1085_v28  ;;  %v941_v10 = vmax.f32 %v2674_v13, %v883_v15  ;;  %v1847_v35 = vpop.f32.mrb[83].mxu0  ;;  %v1913_v46 = vpop.f32.mrb[83].mxu1  ;;  %v2678_v27 = vmax.f32 %v2457_v21, %v2459_v29 }
 0x199   : > { %v2679_v21 = vmax.f32 %v2463_v44, %v2465_v48 }
 0x19a   : > { %1327 = vst.msk [vmem:[%s2511_s30 + $0x34] sm:$0xf] %vm1313_vm3, %v1578_v5  ;;  %v1176_v63 = vadd.f32 %v2499_v20, %v1145_v12  ;;  %v1146_v1 = vmax.f32 %v941_v10, %v1088_v19 }
 0x19c   : > { %v1201_v47 = vmax.f32 %v1176_v63, 0.0  ;;  %v1177_v32 = vadd.f32 %v2499_v20, %v1146_v1 }
 0x19d   : > { %v888_v33 = vpop.f32.mrb[84].mxu0  ;;  %v1093_v2 = vpop.f32.mrb[84].mxu1 }
 0x19e   : > { %v1579_v17 = vpack.c.bf16 %v1201_v47, %v1201_v47  ;;  %v1202_v18 = vmax.f32 %v1177_v32, 0.0  ;;  %v942_v14 = vmax.f32 %v2675_v11, %v888_v33  ;;  %v1850_v3 = vpop.f32.mrb[85].mxu0  ;;  %v1916_v49 = vpop.f32.mrb[85].mxu1  ;;  %v2680_v47 = vmax.f32 %v2469_v9, %v2471_v16 }
 0x19f   : > { %v891_v37 = vpop.f32.mrb[86].mxu0  ;;  %v1096_v51 = vpop.f32.mrb[86].mxu1  ;;  %v2681_v9 = vmax.f32 %v2475_v41, %v2477_v31 }
 0x1a0   : > { %1328 = vst.msk [vmem:[%s2511_s30 + $0x38] sm:$0xf] %vm1313_vm3, %v1579_v17  ;;  %v1580_v38 = vpack.c.bf16 %v1202_v18, %v1202_v18  ;;  %v1147_v56 = vmax.f32 %v942_v14, %v1093_v2  ;;  %v943_v0 = vmax.f32 %v2676_v57, %v891_v37  ;;  %v1851_v7 = vpop.f32.mrb[87].mxu0  ;;  %v1917_v8 = vpop.f32.mrb[87].mxu1 }
 0x1a1   : > { %v2682_v7 = vmax.f32 %v2481_v4, %v2483_v6  ;;  %v2683_v4 = vmax.f32 %v2487_v34, %v2489_v45 }
 0x1a2   : > { %1329 = vst.msk [vmem:[%s2511_s30 + $0x3c] sm:$0xf] %vm1313_vm3, %v1580_v38  ;;  %v1178_v24 = vadd.f32 %v2499_v20, %v1147_v56  ;;  %v1148_v26 = vmax.f32 %v943_v0, %v1096_v51 }
 0x1a4   : > { %v1203_v52 = vmax.f32 %v1178_v24, 0.0  ;;  %v1179_v54 = vadd.f32 %v2499_v20, %v1148_v26 }
 0x1a5   : > { %v896_v22 = vpop.f32.mrb[88].mxu0  ;;  %v1101_v42 = vpop.f32.mrb[88].mxu1 }
 0x1a6   : > { %v1581_v23 = vpack.c.bf16 %v1203_v52, %v1203_v52  ;;  %v1204_v59 = vmax.f32 %v1179_v54, 0.0  ;;  %v944_v39 = vmax.f32 %v2677_v36, %v896_v22  ;;  %v1854_v43 = vpop.f32.mrb[89].mxu0  ;;  %v1920_v61 = vpop.f32.mrb[89].mxu1 }
 0x1a7   : > { %v899_v62 = vpop.f32.mrb[90].mxu0  ;;  %v1104_v53 = vpop.f32.mrb[90].mxu1 }
 0x1a8   : > { %1330 = vst.msk [vmem:[%s2511_s30 + $0x40] sm:$0xf] %vm1313_vm3, %v1581_v23  ;;  %v1582_v58 = vpack.c.bf16 %v1204_v59, %v1204_v59  ;;  %v1149_v40 = vmax.f32 %v944_v39, %v1101_v42  ;;  %v945_v50 = vmax.f32 %v2678_v27, %v899_v62  ;;  %v1855_v28 = vpop.f32.mrb[91].mxu0  ;;  %v1921_v30 = vpop.f32.mrb[91].mxu1 }
 0x1aa   : > { %1331 = vst.msk [vmem:[%s2511_s30 + $0x44] sm:$0xf] %vm1313_vm3, %v1582_v58  ;;  %v1180_v55 = vadd.f32 %v2499_v20, %v1149_v40  ;;  %v1150_v60 = vmax.f32 %v945_v50, %v1104_v53 }
 0x1ac   : > { %v1205_v25 = vmax.f32 %v1180_v55, 0.0  ;;  %v1181_v15 = vadd.f32 %v2499_v20, %v1150_v60 }
 0x1ad   : > { %v904_v5 = vpop.f32.mrb[92].mxu0  ;;  %v1109_v10 = vpop.f32.mrb[92].mxu1 }
 0x1ae   : > { %v1583_v12 = vpack.c.bf16 %v1205_v25, %v1205_v25  ;;  %v1206_v13 = vmax.f32 %v1181_v15, 0.0  ;;  %v946_v29 = vmax.f32 %v2679_v21, %v904_v5  ;;  %v1858_v19 = vpop.f32.mrb[93].mxu0  ;;  %v1924_v35 = vpop.f32.mrb[93].mxu1 }
 0x1af   : > { %v907_v46 = vpop.f32.mrb[94].mxu0  ;;  %v1112_v33 = vpop.f32.mrb[94].mxu1 }
 0x1b0   : > { %1332 = vst.msk [vmem:[%s2511_s30 + $0x48] sm:$0xf] %vm1313_vm3, %v1583_v12  ;;  %v1584_v63 = vpack.c.bf16 %v1206_v13, %v1206_v13  ;;  %v1151_v1 = vmax.f32 %v946_v29, %v1109_v10  ;;  %v947_v32 = vmax.f32 %v2680_v47, %v907_v46  ;;  %v1859_v17 = vpop.f32.mrb[95].mxu0  ;;  %v1925_v18 = vpop.f32.mrb[95].mxu1 }
 0x1b2   : > { %1333 = vst.msk [vmem:[%s2511_s30 + $0x4c] sm:$0xf] %vm1313_vm3, %v1584_v63  ;;  %v1182_v44 = vadd.f32 %v2499_v20, %v1151_v1  ;;  %v1152_v48 = vmax.f32 %v947_v32, %v1112_v33 }
 0x1b4   : > { %v1207_v11 = vmax.f32 %v1182_v44, 0.0  ;;  %v1183_v14 = vadd.f32 %v2499_v20, %v1152_v48 }
 0x1b5   : > { %v912_v2 = vpop.f32.mrb[96].mxu0  ;;  %v1117_v37 = vpop.f32.mrb[96].mxu1 }
 0x1b6   : > { %v1585_v3 = vpack.c.bf16 %v1207_v11, %v1207_v11  ;;  %v1208_v49 = vmax.f32 %v1183_v14, 0.0  ;;  %v948_v16 = vmax.f32 %v2681_v9, %v912_v2  ;;  %v1862_v38 = vpop.f32.mrb[97].mxu0  ;;  %v1928_v56 = vpop.f32.mrb[97].mxu1 }
 0x1b7   : > { %v915_v57 = vpop.f32.mrb[98].mxu0  ;;  %v1120_v24 = vpop.f32.mrb[98].mxu1 }
 0x1b8   : > { %1334 = vst.msk [vmem:[%s2511_s30 + $0x50] sm:$0xf] %vm1313_vm3, %v1585_v3  ;;  %v1586_v0 = vpack.c.bf16 %v1208_v49, %v1208_v49  ;;  %v1153_v51 = vmax.f32 %v948_v16, %v1117_v37  ;;  %v949_v8 = vmax.f32 %v2682_v7, %v915_v57  ;;  %v1863_v26 = vpop.f32.mrb[99].mxu0  ;;  %v1929_v52 = vpop.f32.mrb[99].mxu1 }
 0x1ba   : > { %1335 = vst.msk [vmem:[%s2511_s30 + $0x54] sm:$0xf] %vm1313_vm3, %v1586_v0  ;;  %v1184_v41 = vadd.f32 %v2499_v20, %v1153_v51  ;;  %v1154_v31 = vmax.f32 %v949_v8, %v1120_v24 }
 0x1bc   : > { %v1209_v54 = vmax.f32 %v1184_v41, 0.0  ;;  %v1185_v22 = vadd.f32 %v2499_v20, %v1154_v31 }
 0x1bd   : > { %v920_v23 = vpop.f32.mrb[100].mxu0  ;;  %v1125_v39 = vpop.f32.mrb[100].mxu1 }
 0x1be   : > { %v1587_v59 = vpack.c.bf16 %v1209_v54, %v1209_v54  ;;  %v1210_v36 = vmax.f32 %v1185_v22, 0.0  ;;  %v950_v6 = vmax.f32 %v2683_v4, %v920_v23  ;;  %v1866_v42 = vpop.f32.mrb[101].mxu0  ;;  %v1932_v43 = vpop.f32.mrb[101].mxu1 }
 0x1bf   : > { %v923_v61 = vpop.f32.mrb[102].mxu0  ;;  %v1128_v40 = vpop.f32.mrb[102].mxu1 }
 0x1c0   : > { %1336 = vst.msk [vmem:[%s2511_s30 + $0x58] sm:$0xf] %vm1313_vm3, %v1587_v59  ;;  %v1588_v62 = vpack.c.bf16 %v1210_v36, %v1210_v36  ;;  %v1155_v58 = vmax.f32 %v950_v6, %v1125_v39  ;;  %v1867_v27 = vpop.f32.mrb[103].mxu0  ;;  %v1933_v50 = vpop.f32.mrb[103].mxu1 }
 0x1c2   : > { %1337 = vst.msk [vmem:[%s2511_s30 + $0x5c] sm:$0xf] %vm1313_vm3, %v1588_v62  ;;  %v1186_v53 = vadd.f32 %v2499_v20, %v1155_v58 }
 0x1c4   : > { %v1211_v28 = vmax.f32 %v1186_v53, 0.0 }
 0x1c6   : > { %v1589_v34 = vpack.c.bf16 %v1211_v28, %v1211_v28 }
 0x1c8   : > { %1339 = vst.msk [vmem:[%s2511_s30 + $0x60] sm:$0x3] %vm1338_vm4, %v1589_v34 }
 0x1c9 PF: > { %s13_s12 = sadd.s32 1, %s1992_s12  }
 0x1ca   : > { %p10_p4 = scmp.ge.s32.totalorder %s13_s12, 4  }
 0x1cc   :  { %12 = sbr.rel (!%p10_p4) target bundleno = 1 (0x1), region = 65 }

// kernel: lenet5_forward.4
= control target key start
LH: loop header
LB: loop body
LE: loop exit
PB: predicated region body
PF: predicated region fallthrough
CT: control target
= control target key end

     0   :  { %s1787_s12 = smov 0   ;;  %s2082_s0 = inlined_call_operand.vmem [shape: bf16[2,25,288], index: 0, kind: input, shape index: {}]   ;;  %s2083_s1 = inlined_call_operand.vmem [shape: bf16[4,288,16], index: 1, kind: input, shape index: {}]   ;;  %s2084_s2 = inlined_call_operand.vmem [shape: f32[1,16], index: 2, kind: input, shape index: {}]   ;;  %s2085_s3 = inlined_call_operand.vmem [shape: bf16[2,25,16], index: 3, kind: output, shape index: {}]  }
   0x1 LB: > { %s1296_s13 = sadd.s32 4294967295, %s1765_s12   ;;  %p1300_p0 = scmp.ge.s32.totalorder %s1765_s12, 1  ;;  %s1765_s12 = sphi %s1787_s12, %s13_s12  }
   0x2   : > { %p137_p1 = scmp.lt.s32.totalorder %s1765_s12, 3 }
   0x4   : > { %p138_p2 = pnand %p1300_p0, %p137_p1 }
   0x5   : > { %v1679_v0 = vld [vmem:[%s2083_s1 + $0x40] sm:$0xff] (!%p138_p2)   ;;  %p161_p3 = scmp.lt.s32.totalorder (!%p138_p2), %s1296_s13, 1  ;;  %v1682_v3 = vld [vmem:[%s2083_s1 + $0x48] sm:$0xff] (!%p138_p2)   ;;  %v1685_v6 = vld [vmem:[%s2083_s1 + $0x50] sm:$0xff] (!%p138_p2)   ;;  %vm466_vm0 = vcmask (!%p138_p2), 261120   ;;  %vm1231_vm1 = vcmask (!%p138_p2), 125952  }
   0x6   : > { %141 = sbr.rel (%p138_p2) target bundleno = 333 (0x14d), region = 32  ;;  %v1680_v1 = vld [vmem:[%s2083_s1 + $0x80] sm:$0xff] (!%p138_p2)   ;;  %1510 = vmatprep.subr.bf16.mxu0 (!%p138_p2), %v1679_v0  ;;  %v1683_v4 = vld [vmem:[%s2083_s1 + $0x88] sm:$0xff] (!%p138_p2)   ;;  %v1687_v8 = vld [vmem:[%s2083_s1 + $0xd0] sm:$0xff] (!%p138_p2)   ;;  %vm1235_vm2 = vcmask (!%p138_p2), 122880  }
   0x7   : > { %v1681_v2 = vld [vmem:[%s2083_s1] sm:$0xff] (!%p138_p2)   ;;  %1638 = vmatprep.subr.bf16.mxu1 (!%p138_p2), %v1680_v1  ;;  %v1684_v5 = vld [vmem:[%s2083_s1 + $0x8] sm:$0xff] (!%p138_p2)   ;;  %v1688_v9 = vld [vmem:[%s2083_s1 + $0x10] sm:$0xff] (!%p138_p2)   ;;  %vm1236_vm3 = vsmask.f32 (!%p138_p2), 256 }
   0x8   : > { %1511 = vmatpush3.bf16.msra.mxu0 (!%p138_p2), %v1681_v2  ;;  %1639 = vmatpush3.bf16.msra.mxu1 (!%p138_p2), %v1680_v1  ;;  %v1690_v11 = vld [vmem:[%s2083_s1 + $0x90] sm:$0xff] (!%p138_p2)   ;;  %v1691_v12 = vld [vmem:[%s2083_s1 + $0x58] sm:$0xff] (!%p138_p2)   ;;  %v1695_v16 = vld [vmem:[%s2083_s1 + $0x60] sm:$0xff] (!%p138_p2)  }
   0x9   : > { %1512 = vmatprep.subr.bf16.mxu0 (!%p138_p2), %v1682_v3  ;;  %1640 = vmatprep.subr.bf16.mxu1 (!%p138_p2), %v1683_v4  ;;  %v1692_v13 = vld [vmem:[%s2083_s1 + $0xd8] sm:$0xff] (!%p138_p2)   ;;  %v1696_v17 = vld [vmem:[%s2083_s1 + $0xe0] sm:$0xff] (!%p138_p2)   ;;  %v1699_v20 = vld [vmem:[%s2083_s1 + $0x68] sm:$0xff] (!%p138_p2)  }
   0xa   : > { %v1693_v14 = vld [vmem:[%s2083_s1 + $0x18] sm:$0xff] (!%p138_p2)   ;;  %v1697_v18 = vld [vmem:[%s2083_s1 + $0x20] sm:$0xff] (!%p138_p2)   ;;  %v1700_v21 = vld [vmem:[%s2083_s1 + $0xe8] sm:$0xff] (!%p138_p2)  }
   0xb   : > { %v1694_v15 = vld [vmem:[%s2083_s1 + $0x98] sm:$0xff] (!%p138_p2)   ;;  %v1698_v19 = vld [vmem:[%s2083_s1 + $0xa0] sm:$0xff] (!%p138_p2)   ;;  %v1701_v22 = vld [vmem:[%s2083_s1 + $0x28] sm:$0xff] (!%p138_p2)  }
   0xc   : > { %1513 = vmatpush3.bf16.msra.mxu0 (!%p138_p2), %v1684_v5  ;;  %1641 = vmatpush3.bf16.msra.mxu1 (!%p138_p2), %v1683_v4  ;;  %v1702_v23 = vld [vmem:[%s2083_s1 + $0xa8] sm:$0xff] (!%p138_p2)   ;;  %v1703_v24 = vld [vmem:[%s2083_s1 + $0x70] sm:$0xff] (!%p138_p2)   ;;  %v1707_v28 = vld [vmem:[%s2083_s1 + $0x78] sm:$0xff] (!%p138_p2)  }
   0xd   : > { %s2087_s13 = smov (!%p161_p3, %s1296_s13), 1  ;;  %1514 = vmatprep.subr.bf16.mxu0 %v1685_v6  ;;  %1542 = vmatprep.subr.bf16.mxu1 %v1687_v8  ;;  %v1704_v25 = vld [vmem:[%s2083_s1 + $0xf0] sm:$0xff]   ;;  %v1708_v29 = vld [vmem:[%s2083_s1 + $0xf8] sm:$0xff]   ;;  %v1714_v34 = vld [vmem:[%s2083_s1 + $0x100] sm:$0xff]  }
   0xe   : > { %s1670_s24 = smul.u32 48, %s2087_s13  ;;  %v1705_v26 = vld [vmem:[%s2083_s1 + $0x30] sm:$0xff]   ;;  %v1709_v30 = vld [vmem:[%s2083_s1 + $0x38] sm:$0xff]   ;;  %v1716_v36 = vld [vmem:[%s2083_s1 + $0xc0] sm:$0xff]   ;;  %s1505_s16 = sshll.u32 %s2087_s13, 4 }
   0xf   : > { %v1706_v27 = vld [vmem:[%s2083_s1 + $0xb0] sm:$0xff]   ;;  %v1710_v31 = vld [vmem:[%s2083_s1 + $0xb8] sm:$0xff]   ;;  %v1717_v37 = vld [vmem:[%s2083_s1 + $0x108] sm:$0xff]   ;;  %s170_s19 = scalar_lea.vmem %s2085_s3, %s1505_s16 }
  0x10   : > { %s1822_s4 = scalar_lea.vmem %s2082_s0, %s1670_s24  ;;  %1515 = vmatpush3.bf16.msra.mxu0 %v1688_v9  ;;  %v1715_v35 = vld [vmem:[%s2083_s1 + $0x110] sm:$0xff]   ;;  %v1718_v38 = vld [vmem:[%s2083_s1 + $0xc8] sm:$0xff]   ;;  %v1722_v41 = vld [vmem:[%s2083_s1 + $0x118] sm:$0xff]  }
  0x11   : > { %v1825_v7 = vld [vmem:[%s1822_s4 + $0x8] ss:$12 sps:$4 sm:$0xff]   ;;  %v1836_v10 = vld [vmem:[%s1822_s4 + $0x20] ss:$12 sps:$4 sm:$0x1f]   ;;  %1516 = vmatprep.subr.bf16.mxu0 %v1691_v12  ;;  %v1731_v50 = vld [vmem:[%s2083_s1 + $0x178] sm:$0xff]  }
  0x12   : > { %1642 = vmatprep.mubr.msk.bf16.mxu1 %vm466_vm0, %v1825_v7  ;;  %v1904_v32 = vld [vmem:[%s1822_s4 + $0x4] ss:$12 sps:$4 sm:$0xff]   ;;  %v1907_v33 = vld [vmem:[%s1822_s4] ss:$12 sps:$4 sm:$0xff]   ;;  %v1732_v52 = vld [vmem:[%s2083_s1 + $0x138] sm:$0xff]  }
  0x13   : > { %1643 = vmatmul.mubr.msk.bf16.vlgmr.msra.gmra.mrb[0].mxu1 %vm466_vm0, %v1836_v10  ;;  %505 = vmatprep.mubr.bf16.mxu0 %v1904_v32  ;;  %v1928_v39 = vld [vmem:[%s1822_s4 + $0x1c] ss:$12 sps:$4 sm:$0x1f]   ;;  %v1931_v40 = vld [vmem:[%s1822_s4 + $0x18] ss:$12 sps:$4 sm:$0x1f]   ;;  %vm1237_vm4 = vmand %vm1235_vm2, %vm1236_vm3 }
  0x14   : > { %1543 = vmatpush3.bf16.msra.mxu1 %v1690_v11  ;;  %1517 = vmatpush3.bf16.msra.mxu0 %v1693_v14  ;;  %v1723_v42 = vld [vmem:[%s2083_s1 + $0x160] sm:$0xff]   ;;  %v1725_v44 = vld [vmem:[%s2083_s1 + $0x168] sm:$0xff]   ;;  %v1728_v47 = vld [vmem:[%s2083_s1 + $0x170] sm:$0xff]  }
  0x15   : > { %1544 = vmatprep.subr.bf16.mxu1 %v1692_v13  ;;  %1518 = vmatprep.subr.bf16.mxu0 %v1695_v16  ;;  %v1724_v43 = vld [vmem:[%s2083_s1 + $0x120] sm:$0xff]   ;;  %v1726_v46 = vld [vmem:[%s2083_s1 + $0x128] sm:$0xff]   ;;  %v1729_v49 = vld [vmem:[%s2083_s1 + $0x130] sm:$0xff]  }
  0x16   : > { %711 = vmatprep.mubr.bf16.mxu1 %v1904_v32  ;;  %v1727_v45 = vld [vmem:[%s2083_s1 + $0x1a0] sm:$0xff]   ;;  %v1730_v48 = vld [vmem:[%s2083_s1 + $0x1a8] sm:$0xff]   ;;  %v1733_v51 = vld [vmem:[%s2083_s1 + $0x1f0] sm:$0xff]  }
  0x17   : > { %v1734_v53 = vld [vmem:[%s2083_s1 + $0x180] sm:$0xff]   ;;  %v1735_v54 = vld [vmem:[%s2083_s1 + $0x1b0] sm:$0xff]   ;;  %v1737_v55 = vld [vmem:[%s2083_s1 + $0x1f8] sm:$0xff]  }
  0x18   : > { %1545 = vmatpush3.bf16.msra.mxu1 %v1694_v15  ;;  %1519 = vmatpush3.bf16.msra.mxu0 %v1697_v18  ;;  %v1736_v56 = vld [vmem:[%s2083_s1 + $0x140] sm:$0xff]   ;;  %v1738_v57 = vld [vmem:[%s2083_s1 + $0x188] sm:$0xff]   ;;  %v1739_v58 = vld [vmem:[%s2083_s1 + $0x1b8] sm:$0xff]  }
  0x19   : > { %1546 = vmatprep.subr.bf16.mxu1 %v1696_v17  ;;  %1520 = vmatprep.subr.bf16.mxu0 %v1699_v20  ;;  %v1741_v59 = vld [vmem:[%s2083_s1 + $0x200] sm:$0xff]   ;;  %v1740_v60 = vld [vmem:[%s2083_s1 + $0x148] sm:$0xff]   ;;  %v1742_v61 = vld [vmem:[%s2083_s1 + $0x190] sm:$0xff]  }
  0x1a   : > { %v1743_v62 = vld [vmem:[%s2083_s1 + $0x1c0] sm:$0xff]   ;;  %v1745_v63 = vld [vmem:[%s2083_s1 + $0x208] sm:$0xff]   ;;  %v1744_v0 = vld [vmem:[%s2083_s1 + $0x150] sm:$0xff]  }
  0x1b   : > { %v1746_v1 = vld [vmem:[%s2083_s1 + $0x198] sm:$0xff]   ;;  %v1747_v2 = vld [vmem:[%s2083_s1 + $0x1c8] sm:$0xff]   ;;  %v1749_v3 = vld [vmem:[%s2083_s1 + $0x210] sm:$0xff]  }
  0x1c   : > { %1547 = vmatpush3.bf16.msra.mxu1 %v1698_v19  ;;  %1521 = vmatpush3.bf16.msra.mxu0 %v1701_v22  ;;  %v1748_v4 = vld [vmem:[%s2083_s1 + $0x158] sm:$0xff]   ;;  %v1750_v5 = vld [vmem:[%s2083_s1 + $0x1d0] sm:$0xff]   ;;  %v1753_v12 = vld [vmem:[%s2083_s1 + $0x220] sm:$0xff]  }
  0x1d   : > { %1548 = vmatprep.subr.bf16.mxu1 %v1700_v21  ;;  %1522 = vmatprep.subr.bf16.mxu0 %v1703_v24  ;;  %v1751_v6 = vld [vmem:[%s2083_s1 + $0x218] sm:$0xff]   ;;  %v1755_v8 = vld [vmem:[%s2083_s1 + $0x230] sm:$0xff]   ;;  %v1754_v13 = vld [vmem:[%s2083_s1 + $0x1e0] sm:$0xff]  }
  0x1e   : > { %v1752_v9 = vld [vmem:[%s2083_s1 + $0x1d8] sm:$0xff]   ;;  %v1756_v14 = vld [vmem:[%s2083_s1 + $0x228] sm:$0xff]  }
  0x1f   : > { %v1758_v11 = vld [vmem:[%s2083_s1 + $0x238] sm:$0xff]   ;;  %v1757_v15 = vld [vmem:[%s2083_s1 + $0x1e8] sm:$0xff]  }
  0x20   : > { %1549 = vmatpush3.bf16.msra.mxu1 %v1702_v23  ;;  %1523 = vmatpush3.bf16.msra.mxu0 %v1705_v26 }
  0x21   : > { %1550 = vmatprep.subr.bf16.mxu1 %v1704_v25  ;;  %1524 = vmatprep.subr.bf16.mxu0 %v1707_v28 }
  0x24   : > { %1551 = vmatpush3.bf16.msra.mxu1 %v1706_v27  ;;  %1525 = vmatpush3.bf16.msra.mxu0 %v1709_v30 }
  0x25   : > { %1552 = vmatprep.subr.bf16.mxu1 %v1708_v29  ;;  %1646 = vmatprep.subr.bf16.mxu0 %v1715_v35 }
  0x27   : > { %506 = vmatmul.mubr.bf16.vlgmr.msra.gmra.mrb[0].mxu0 %v1907_v33 }
  0x28   : > { %1553 = vmatpush3.bf16.msra.mxu1 %v1710_v31  ;;  %1647 = vmatpush3.bf16.msra.mxu0 %v1715_v35 }
  0x29   : > { %1554 = vmatprep.subr.bf16.mxu1 %v1714_v34  ;;  %513 = vmatprep.mubr.bf16.mxu0 %v1928_v39 }
  0x2a   : > { %1648 = vmatprep.subr.bf16.mxu0 %v1722_v41 }
  0x2c   : > { %1555 = vmatpush3.bf16.msra.mxu1 %v1716_v36  ;;  %1649 = vmatpush3.bf16.msra.mxu0 %v1722_v41 }
  0x2d   : > { %1556 = vmatprep.subr.bf16.mxu1 %v1717_v37  ;;  %1654 = vmatprep.subr.bf16.mxu0 %v1727_v45 }
  0x2f   : > { %514 = vmatmul.mubr.bf16.gmra.mrb[4].mxu0 %v1931_v40 }
  0x30   : > { %1557 = vmatpush3.bf16.msra.mxu1 %v1718_v38  ;;  %1650 = vmatprep.mubr.msk.bf16.mxu0 %vm466_vm0, %v1825_v7 }
  0x31   : > { %1574 = vmatprep.subr.bf16.mxu1 %v1723_v42 }
  0x33   : > { %712 = vmatmul.mubr.bf16.vlgmr.msra.gmra.mrb[4].mxu1 %v1907_v33 }
  0x34   : > { %1575 = vmatpush3.bf16.msra.mxu1 %v1724_v43  ;;  %719 = vmatprep.mubr.bf16.mxu1 %v1928_v39 }
  0x35   : > { %1576 = vmatprep.subr.bf16.mxu1 %v1725_v44 }
  0x37   : > { %1651 = vmatmul.mubr.msk.bf16.vlgmr.msra.gmra.mrb[8].mxu0 %vm466_vm0, %v1836_v10 }
  0x38   : > { %1577 = vmatpush3.bf16.msra.mxu1 %v1726_v46  ;;  %1655 = vmatpush3.bf16.msra.mxu0 %v1727_v45 }
  0x39   : > { %1578 = vmatprep.subr.bf16.mxu1 %v1728_v47  ;;  %1658 = vmatprep.mubr.msk.bf16.mxu0 %vm466_vm0, %v1825_v7 }
  0x3a   : > { %1656 = vmatprep.subr.bf16.mxu0 %v1730_v48 }
  0x3b   : > { %720 = vmatmul.mubr.bf16.gmra.mrb[8].mxu1 %v1931_v40 }
  0x3c   : > { %1579 = vmatpush3.bf16.msra.mxu1 %v1729_v49  ;;  %921 = vmatprep.mubr.bf16.mxu1 %v1904_v32 }
  0x3d   : > { %1580 = vmatprep.subr.bf16.mxu1 %v1731_v50  ;;  %1657 = vmatpush3.bf16.msra.mxu0 %v1730_v48 }
  0x3e   : > { %1606 = vmatprep.subr.bf16.mxu0 %v1733_v51 }
  0x40   : > { %1581 = vmatpush3.bf16.msra.mxu1 %v1732_v52  ;;  %1659 = vmatmul.mubr.msk.bf16.vlgmr.msra.gmra.mrb[12].mxu0 %vm466_vm0, %v1836_v10 }
  0x41   : > { %1582 = vmatprep.subr.bf16.mxu1 %v1734_v53  ;;  %1607 = vmatpush3.bf16.msra.mxu0 %v1735_v54 }
  0x42   : > { %1131 = vmatprep.mubr.bf16.mxu0 %v1904_v32  ;;  %1608 = vmatprep.subr.bf16.mxu0 %v1737_v55 }
  0x44   : > { %1583 = vmatpush3.bf16.msra.mxu1 %v1736_v56 }
  0x45   : > { %1584 = vmatprep.subr.bf16.mxu1 %v1738_v57  ;;  %1609 = vmatpush3.bf16.msra.mxu0 %v1739_v58 }
  0x46   : > { %1610 = vmatprep.subr.bf16.mxu0 %v1741_v59 }
  0x48   : > { %1585 = vmatpush3.bf16.msra.mxu1 %v1740_v60 }
  0x49   : > { %1586 = vmatprep.subr.bf16.mxu1 %v1742_v61  ;;  %1611 = vmatpush3.bf16.msra.mxu0 %v1743_v62 }
  0x4a   : > { %1612 = vmatprep.subr.bf16.mxu0 %v1745_v63 }
  0x4c   : > { %1587 = vmatpush3.bf16.msra.mxu1 %v1744_v0 }
  0x4d   : > { %1588 = vmatprep.subr.bf16.mxu1 %v1746_v1  ;;  %1613 = vmatpush3.bf16.msra.mxu0 %v1747_v2 }
  0x4e   : > { %1614 = vmatprep.subr.bf16.mxu0 %v1749_v3 }
  0x50   : > { %1589 = vmatpush3.bf16.msra.mxu1 %v1748_v4 }
  0x51   : > { %1662 = vmatprep.subr.bf16.mxu1 %v1755_v8  ;;  %1615 = vmatpush3.bf16.msra.mxu0 %v1750_v5 }
  0x52   : > { %1616 = vmatprep.subr.bf16.mxu0 %v1751_v6 }
  0x53   : > { %922 = vmatmul.mubr.bf16.vlgmr.msra.gmra.mrb[12].mxu1 %v1907_v33 }
  0x54   : > { %929 = vmatprep.mubr.bf16.mxu1 %v1928_v39  ;;  %1663 = vmatpush3.bf16.msra.mxu1 %v1755_v8 }
  0x55   : > { %1664 = vmatprep.subr.bf16.mxu1 %v1758_v11  ;;  %1617 = vmatpush3.bf16.msra.mxu0 %v1752_v9 }
  0x56   : > { %1618 = vmatprep.subr.bf16.mxu0 %v1753_v12 }
  0x58   : > { %1665 = vmatpush3.bf16.msra.mxu1 %v1758_v11 }
  0x59   : > { %1619 = vmatpush3.bf16.msra.mxu0 %v1754_v13 }
  0x5a   : > { %1620 = vmatprep.subr.bf16.mxu0 %v1756_v14 }
  0x5b   : > { %930 = vmatmul.mubr.bf16.gmra.mrb[16].mxu1 %v1931_v40 }
  0x5c   : > { %1666 = vmatprep.mubr.msk.bf16.mxu1 %vm466_vm0, %v1825_v7 }
  0x5d   : > { %1621 = vmatpush3.bf16.msra.mxu0 %v1757_v15 }
  0x60   : > { %1132 = vmatmul.mubr.bf16.vlgmr.msra.gmra.mrb[16].mxu0 %v1907_v33 }
  0x61   : > { %1139 = vmatprep.mubr.bf16.mxu0 %v1928_v39 }
  0x63   : > { %1667 = vmatmul.mubr.msk.bf16.vlgmr.msra.gmra.mrb[20].mxu1 %vm466_vm0, %v1836_v10 }
  0x68   : > { %1140 = vmatmul.mubr.bf16.gmra.mrb[20].mxu0 %v1931_v40 }
  0xe6   : > { %v1644_v16 = vpop.f32.mrb[0].mxu1 }
  0xe7   : > { %v556_v17 = vpop.f32.mrb[1].mxu1 }
  0xe8   : > { %v1645_v18 = vpop.f32.mrb[2].mxu1 }
  0xe9   : > { %v559_v19 = vpop.f32.mrb[3].mxu1 }
  0xfa   : > { %v1526_v20 = vpop.f32.mrb[0].mxu0 }
  0xfb   : > { %v1527_v21 = vpop.f32.mrb[1].mxu0 }
  0xfc   : > { %v1528_v22 = vadd.f32 %v1527_v21, %v1526_v20  ;;  %v1529_v23 = vpop.f32.mrb[2].mxu0 }
  0xfd   : > { %v1530_v24 = vpop.f32.mrb[3].mxu0 }
  0xfe   : > { %v557_v7 = vadd.f32 %v1528_v22, %v556_v17  ;;  %v1531_v25 = vadd.f32 %v1530_v24, %v1529_v23 }
 0x100   : > { %v560_v26 = vadd.f32 %v1531_v25, %v559_v19 }
 0x102   : > { %v1532_v27 = vpop.f32.mrb[4].mxu0 }
 0x103   : > { %v1533_v28 = vpop.f32.mrb[5].mxu0 }
 0x104   : > { %v1534_v29 = vadd.f32 %v1533_v28, %v1532_v27  ;;  %v1535_v30 = vpop.f32.mrb[6].mxu0 }
 0x105   : > { %v1536_v10 = vpop.f32.mrb[7].mxu0 }
 0x106   : > { %v1558_v31 = vpop.f32.mrb[4].mxu1  ;;  %v565_v33 = vadd.f32 %v1644_v16, %v1534_v29  ;;  %v1537_v34 = vadd.f32 %v1536_v10, %v1535_v30  ;;  %v1498_v29 = vld [vmem:[%s2084_s2] ss:$0 sm:$0xff] }
 0x107   : > { %v1559_v32 = vpop.f32.mrb[5].mxu1 }
 0x108   : > { %v1560_v35 = vadd.f32 %v1559_v32, %v1558_v31  ;;  %v1561_v36 = vpop.f32.mrb[6].mxu1  ;;  %v568_v38 = vadd.f32 %v1645_v18, %v1537_v34 }
 0x109   : > { %v1562_v37 = vpop.f32.mrb[7].mxu1 }
 0x10a   : > { %v1563_v39 = vadd.f32 %v1562_v37, %v1561_v36  ;;  %v1652_v40 = vpop.f32.mrb[8].mxu0 }
 0x10b   : > { %v762_v41 = vpop.f32.mrb[9].mxu0 }
 0x10c   : > { %v763_v43 = vadd.f32 %v1560_v35, %v762_v41  ;;  %v1653_v44 = vpop.f32.mrb[10].mxu0 }
 0x10d   : > { %v765_v46 = vpop.f32.mrb[11].mxu0 }
 0x10e   : > { %v1564_v42 = vpop.f32.mrb[8].mxu1  ;;  %v777_v48 = vmax.f32 %v557_v7, %v763_v43  ;;  %v766_v50 = vadd.f32 %v1563_v39, %v765_v46 }
 0x10f   : > { %v1565_v45 = vpop.f32.mrb[9].mxu1 }
 0x110   : > { %v1566_v47 = vadd.f32 %v1565_v45, %v1564_v42  ;;  %v1567_v49 = vpop.f32.mrb[10].mxu1  ;;  %v778_v54 = vmax.f32 %v560_v26, %v766_v50 }
 0x111   : > { %v1568_v51 = vpop.f32.mrb[11].mxu1 }
 0x112   : > { %v771_v52 = vadd.f32 %v1652_v40, %v1566_v47  ;;  %v1569_v53 = vadd.f32 %v1568_v51, %v1567_v49 }
 0x113   : > { %v1660_v57 = vpop.f32.mrb[12].mxu0 }
 0x114   : > { %v779_v55 = vmax.f32 %v565_v33, %v771_v52  ;;  %v774_v56 = vadd.f32 %v1653_v44, %v1569_v53  ;;  %v972_v58 = vpop.f32.mrb[13].mxu0 }
 0x115   : > { %v1661_v60 = vpop.f32.mrb[14].mxu0 }
 0x116   : > { %v780_v59 = vmax.f32 %v568_v38, %v774_v56  ;;  %v975_v61 = vpop.f32.mrb[15].mxu0 }
 0x126   : > { %v1590_v62 = vpop.f32.mrb[12].mxu1 }
 0x127   : > { %v1591_v63 = vpop.f32.mrb[13].mxu1 }
 0x128   : > { %v1592_v0 = vadd.f32 %v1591_v63, %v1590_v62  ;;  %v1593_v1 = vpop.f32.mrb[14].mxu1 }
 0x129   : > { %v1594_v2 = vpop.f32.mrb[15].mxu1 }
 0x12a   : > { %v973_v3 = vadd.f32 %v1592_v0, %v972_v58  ;;  %v1595_v4 = vadd.f32 %v1594_v2, %v1593_v1 }
 0x12c   : > { %v976_v5 = vadd.f32 %v1595_v4, %v975_v61  ;;  %v987_v6 = vmax.f32 %v777_v48, %v973_v3 }
 0x12e   : > { %v1596_v8 = vpop.f32.mrb[16].mxu1  ;;  %v988_v9 = vmax.f32 %v778_v54, %v976_v5  ;;  %v1238_v54 = vld [vmem:[%s170_s19 + $0xc] sm:$0x1] }
 0x12f   : > { %v1597_v11 = vpop.f32.mrb[17].mxu1 }
 0x130   : > { %v1598_v12 = vadd.f32 %v1597_v11, %v1596_v8  ;;  %v1599_v13 = vpop.f32.mrb[18].mxu1 }
 0x131   : > { %v1600_v14 = vpop.f32.mrb[19].mxu1 }
 0x132   : > { %v981_v15 = vadd.f32 %v1660_v57, %v1598_v12  ;;  %v1601_v16 = vadd.f32 %v1600_v14, %v1599_v13 }
 0x133   : > { %v1622_v19 = vpop.f32.mrb[16].mxu0 }
 0x134   : > { %v989_v17 = vmax.f32 %v779_v55, %v981_v15  ;;  %v984_v18 = vadd.f32 %v1661_v60, %v1601_v16  ;;  %v1623_v20 = vpop.f32.mrb[17].mxu0 }
 0x135   : > { %v1624_v22 = vadd.f32 %v1623_v20, %v1622_v19  ;;  %v1625_v23 = vpop.f32.mrb[18].mxu0 }
 0x136   : > { %v990_v21 = vmax.f32 %v780_v59, %v984_v18  ;;  %v1668_v24 = vpop.f32.mrb[20].mxu1  ;;  %v1626_v7 = vpop.f32.mrb[19].mxu0 }
 0x137   : > { %v1182_v25 = vpop.f32.mrb[21].mxu1  ;;  %v1627_v26 = vadd.f32 %v1626_v7, %v1625_v23 }
 0x138   : > { %v1183_v27 = vadd.f32 %v1624_v22, %v1182_v25  ;;  %v1669_v28 = vpop.f32.mrb[22].mxu1 }
 0x139   : > { %v1185_v30 = vpop.f32.mrb[23].mxu1 }
 0x13a   : > { %v1197_v31 = vmax.f32 %v987_v6, %v1183_v27  ;;  %v1186_v10 = vadd.f32 %v1627_v26, %v1185_v30 }
 0x13b   : > { %v1628_v34 = vpop.f32.mrb[20].mxu0 }
 0x13c   : > { %v1207_v32 = vadd.f32 %v1498_v29, %v1197_v31  ;;  %v1198_v33 = vmax.f32 %v988_v9, %v1186_v10  ;;  %v1629_v35 = vpop.f32.mrb[21].mxu0 }
 0x13d   : > { %v1630_v38 = vadd.f32 %v1629_v35, %v1628_v34  ;;  %v1631_v39 = vpop.f32.mrb[22].mxu0 }
 0x13e   : > { %v1211_v36 = vmax.f32 %v1207_v32, 0.0  ;;  %v1208_v37 = vadd.f32 %v1498_v29, %v1198_v33  ;;  %v1632_v40 = vpop.f32.mrb[23].mxu0 }
 0x13f   : > { %v1191_v43 = vadd.f32 %v1668_v24, %v1630_v38  ;;  %v1633_v44 = vadd.f32 %v1632_v40, %v1631_v39 }
 0x140   : > { %v1506_v41 = vpack.c.bf16 %v1211_v36, %v1211_v36  ;;  %v1212_v42 = vmax.f32 %v1208_v37, 0.0 }
 0x141   : > { %v1199_v46 = vmax.f32 %v989_v17, %v1191_v43  ;;  %v1194_v47 = vadd.f32 %v1669_v28, %v1633_v44 }
 0x142   : > { %1232 = vst.msk [vmem:[%s170_s19] sm:$0xf] %vm1231_vm1, %v1506_v41  ;;  %v1507_v45 = vpack.c.bf16 %v1212_v42, %v1212_v42 }
 0x143   : > { %v1209_v48 = vadd.f32 %v1498_v29, %v1199_v46  ;;  %v1200_v49 = vmax.f32 %v990_v21, %v1194_v47 }
 0x144   : > { %1233 = vst.msk [vmem:[%s170_s19 + $0x4] sm:$0xf] %vm1231_vm1, %v1507_v45 }
 0x145   : > { %v1213_v50 = vmax.f32 %v1209_v48, 0.0  ;;  %v1210_v51 = vadd.f32 %v1498_v29, %v1200_v49 }
 0x147   : > { %v1508_v52 = vpack.c.bf16 %v1213_v50, %v1213_v50  ;;  %v1214_v53 = vmax.f32 %v1210_v51, 0.0 }
 0x149   : > { %1234 = vst.msk [vmem:[%s170_s19 + $0x8] sm:$0xf] %vm1231_vm1, %v1508_v52  ;;  %v1509_v55 = vpack.c.bf16 %v1214_v53, %v1214_v53 }
 0x14b   : > { %v1239_v56 = vsel %vm1237_vm4, %v1509_v55, %v1238_v54 }
 0x14c   : > { %1240 = vst [vmem:[%s170_s19 + $0xc] sm:$0x1] %v1239_v56 }
 0x14d PF: > { %s13_s12 = sadd.s32 1, %s1765_s12  }
 0x14e   : > { %p10_p4 = scmp.ge.s32.totalorder %s13_s12, 4  }
 0x150   :  { %12 = sbr.rel (!%p10_p4) target bundleno = 1 (0x1), region = 65 }

// kernel: lenet5_forward.5
= control target key start
LH: loop header
LB: loop body
LE: loop exit
PB: predicated region body
PF: predicated region fallthrough
CT: control target
= control target key end

     0   :  { %v742_v0 = vmov 0   ;;  %vm249_vm0 = vcmask 130048   ;;  %v743_v32 = vmov 0.0   ;;  %vm744_vm1 = vmmov 0   ;;  %s953_s1 = inlined_call_operand.vmem [shape: bf16[400,128], index: 1, kind: input, shape index: {}]   ;;  %s954_s0 = inlined_call_operand.vmem [shape: bf16[8,400], index: 0, kind: input, shape index: {}]   ;;  %s955_s3 = inlined_call_operand.vmem [shape: bf16[128,128], index: 3, kind: input, shape index: {}]   ;;  %s956_s5 = inlined_call_operand.vmem [shape: bf16[128,10], index: 5, kind: input, shape index: {}]   ;;  %s957_s2 = inlined_call_operand.vmem [shape: f32[1,128], index: 2, kind: input, shape index: {}]   ;;  %s958_s4 = inlined_call_operand.vmem [shape: f32[1,128], index: 4, kind: input, shape index: {}]   ;;  %s959_s6 = inlined_call_operand.vmem [shape: f32[1,10], index: 6, kind: input, shape index: {}]   ;;  %s960_s7 = inlined_call_operand.vmem [shape: f32[8,10], index: 7, kind: output, shape index: {}]  }
   0x1   :  { %293 = vmatprep.subr.bf16.mxu1 %v742_v0  ;;  %v697_v1 = vld [vmem:[%s953_s1 + $0x40] sm:$0xff]   ;;  %v700_v4 = vld [vmem:[%s953_s1 + $0x48] sm:$0xff]   ;;  %v703_v7 = vld [vmem:[%s953_s1 + $0x50] sm:$0xff]   ;;  %vm559_vm2 = vcmask 80896  }
   0x2   :  { %v698_v2 = vld [vmem:[%s953_s1 + $0x80] sm:$0xff]   ;;  %614 = vmatprep.subr.bf16.mxu0 %v697_v1  ;;  %v701_v5 = vld [vmem:[%s953_s1 + $0x88] sm:$0xff]   ;;  %v704_v8 = vld [vmem:[%s953_s1 + $0x90] sm:$0xff]  }
   0x3   :  { %v699_v3 = vld [vmem:[%s953_s1] sm:$0xff]   ;;  %294 = vmatpush1.bf16.msra.mxu1 %v698_v2  ;;  %v702_v6 = vld [vmem:[%s953_s1 + $0x8] sm:$0xff]   ;;  %v705_v9 = vld [vmem:[%s953_s1 + $0x10] sm:$0xff]  }
   0x4   :  { %615 = vmatpush3.bf16.msra.mxu0 %v699_v3  ;;  %295 = vmatprep.subr.bf16.mxu1 %v742_v0  ;;  %v706_v10 = vld [vmem:[%s953_s1 + $0x58] sm:$0xff]   ;;  %v709_v13 = vld [vmem:[%s953_s1 + $0x60] sm:$0xff]   ;;  %v712_v16 = vld [vmem:[%s953_s1 + $0x68] sm:$0xff]  }
   0x5   :  { %616 = vmatprep.subr.bf16.mxu0 %v700_v4  ;;  %v707_v11 = vld [vmem:[%s953_s1 + $0x98] sm:$0xff]   ;;  %v710_v14 = vld [vmem:[%s953_s1 + $0xa0] sm:$0xff]   ;;  %v713_v17 = vld [vmem:[%s953_s1 + $0xa8] sm:$0xff]  }
   0x6   :  { %v708_v12 = vld [vmem:[%s953_s1 + $0x18] sm:$0xff]   ;;  %v711_v15 = vld [vmem:[%s953_s1 + $0x20] sm:$0xff]   ;;  %v714_v18 = vld [vmem:[%s953_s1 + $0x28] sm:$0xff]  }
   0x7   :  { %296 = vmatpush1.bf16.msra.mxu1 %v701_v5  ;;  %v715_v19 = vld [vmem:[%s953_s1 + $0x70] sm:$0xff]   ;;  %v27_v22 = vld [vmem:[%s954_s0] sm:$0xff]  ;;  %v718_v23 = vld [vmem:[%s953_s1 + $0x78] sm:$0xff]  }
   0x8   :  { %617 = vmatpush3.bf16.msra.mxu0 %v702_v6  ;;  %297 = vmatprep.subr.bf16.mxu1 %v742_v0  ;;  %v716_v20 = vld [vmem:[%s953_s1 + $0xb0] sm:$0xff]   ;;  %v567_v24 = vcombine.high %v27_v22, %v27_v22  ;;  %v28_v25 = vld [vmem:[%s954_s0 + $0x8] sm:$0xff]  ;;  %v719_v27 = vld [vmem:[%s953_s1 + $0xb8] sm:$0xff]   ;;  %v566_v30 = vcombine.low %v27_v22, %v27_v22 }
   0x9   :  { %618 = vmatprep.subr.bf16.mxu0 %v703_v7  ;;  %v717_v21 = vld [vmem:[%s953_s1 + $0x30] sm:$0xff]   ;;  %v569_v26 = vcombine.high %v28_v25, %v28_v25  ;;  %v720_v28 = vld [vmem:[%s953_s1 + $0x38] sm:$0xff]   ;;  %v723_v29 = vld [vmem:[%s953_s1 + $0xc0] sm:$0xff]   ;;  %v568_v33 = vcombine.low %v28_v25, %v28_v25 }
   0xa   :  { %285 = vmatprep.mubr.bf16.mxu0 %v567_v24  ;;  %v726_v31 = vld [vmem:[%s955_s3] sm:$0xff]   ;;  %v727_v34 = vld [vmem:[%s955_s3 + $0x8] sm:$0xff]   ;;  %v728_v35 = vld [vmem:[%s955_s3 + $0x10] sm:$0xff]  }
   0xb   :  { %298 = vmatpush1.bf16.msra.mxu1 %v704_v8  ;;  %595 = vmatprep.mubr.msk.bf16.mxu1 %vm249_vm0, %v569_v26  ;;  %v729_v36 = vld [vmem:[%s955_s3 + $0x18] sm:$0xff]   ;;  %v730_v37 = vld [vmem:[%s955_s3 + $0x20] sm:$0xff]   ;;  %v731_v38 = vld [vmem:[%s955_s3 + $0x28] sm:$0xff]  }
   0xc   :  { %619 = vmatpush3.bf16.msra.mxu0 %v705_v9  ;;  %299 = vmatprep.subr.bf16.mxu1 %v742_v0  ;;  %v732_v39 = vld [vmem:[%s955_s3 + $0x30] sm:$0xff]   ;;  %v733_v40 = vld [vmem:[%s955_s3 + $0x38] sm:$0xff]   ;;  %v734_v41 = vld [vmem:[%s956_s5] sm:$0xff]  }
   0xd   :  { %620 = vmatprep.subr.bf16.mxu0 %v706_v10  ;;  %v735_v42 = vld [vmem:[%s956_s5 + $0x8] sm:$0xff]   ;;  %v736_v43 = vld [vmem:[%s956_s5 + $0x10] sm:$0xff]   ;;  %v737_v44 = vld [vmem:[%s956_s5 + $0x18] sm:$0xff]  }
   0xe   :  { %v738_v45 = vld [vmem:[%s956_s5 + $0x20] sm:$0xff]   ;;  %v739_v46 = vld [vmem:[%s956_s5 + $0x28] sm:$0xff]   ;;  %v740_v61 = vld [vmem:[%s956_s5 + $0x30] sm:$0xff]  }
   0xf   :  { %300 = vmatpush1.bf16.msra.mxu1 %v707_v11  ;;  %v565_v49 = vld [vmem:[%s957_s2] ss:$0 sm:$0xff]  ;;  %v741_v62 = vld [vmem:[%s956_s5 + $0x38] sm:$0xff]  }
  0x10   :  { %621 = vmatpush3.bf16.msra.mxu0 %v708_v12  ;;  %301 = vmatprep.subr.bf16.mxu1 %v742_v0  ;;  %v596_v63 = vld [vmem:[%s958_s4] ss:$0 sm:$0xff] }
  0x11   :  { %622 = vmatprep.subr.bf16.mxu0 %v709_v13  ;;  %v605_v7 = vld [vmem:[%s959_s6] ss:$0 sm:$0xff] }
  0x13   :  { %302 = vmatpush1.bf16.msra.mxu1 %v710_v14 }
  0x14   :  { %623 = vmatpush3.bf16.msra.mxu0 %v711_v15  ;;  %303 = vmatprep.subr.bf16.mxu1 %v742_v0 }
  0x15   :  { %624 = vmatprep.subr.bf16.mxu0 %v712_v16 }
  0x17   :  { %304 = vmatpush1.bf16.msra.mxu1 %v713_v17 }
  0x18   :  { %625 = vmatpush3.bf16.msra.mxu0 %v714_v18  ;;  %305 = vmatprep.subr.bf16.mxu1 %v742_v0 }
  0x19   :  { %626 = vmatprep.subr.bf16.mxu0 %v715_v19 }
  0x1b   :  { %306 = vmatpush1.bf16.msra.mxu1 %v716_v20 }
  0x1c   :  { %627 = vmatpush3.bf16.msra.mxu0 %v717_v21  ;;  %307 = vmatprep.subr.bf16.mxu1 %v742_v0 }
  0x1d   :  { %628 = vmatprep.subr.bf16.mxu0 %v718_v23 }
  0x1f   :  { %308 = vmatpush1.bf16.msra.mxu1 %v719_v27 }
  0x20   :  { %629 = vmatpush3.bf16.msra.mxu0 %v720_v28  ;;  %309 = vmatprep.subr.bf16.mxu1 %v742_v0 }
  0x21   :  { %654 = vmatprep.subr.bf16.mxu0 %v743_v32 }
  0x23   :  { %286 = vmatmul.mubr.bf16.vlgmr.msra.gmra.mrb[0].mxu0 %v566_v30  ;;  %310 = vmatpush1.bf16.msra.mxu1 %v723_v29 }
  0x24   :  { %655 = vmatpush3.bf16.msra.mxu0 %v726_v31  ;;  %674 = vmatprep.subr.bf16.mxu1 %v743_v32 }
  0x25   :  { %656 = vmatprep.subr.bf16.mxu0 %v743_v32  ;;  %670 = vmatprep.mubr.msk.bf16.mxu0 %vm744_vm1, %v743_v32 }
  0x26   :  { %326 = vmatmul.mubr.bf16.vlgmr.msra.gmra.mrb[0].mxu1 %v568_v33 }
  0x27   :  { %690 = vmatprep.mubr.msk.bf16.mxu1 %vm744_vm1, %v743_v32  ;;  %675 = vmatpush3.bf16.msra.mxu1 %v734_v41 }
  0x28   :  { %657 = vmatpush3.bf16.msra.mxu0 %v727_v34  ;;  %676 = vmatprep.subr.bf16.mxu1 %v743_v32 }
  0x29   :  { %658 = vmatprep.subr.bf16.mxu0 %v743_v32 }
  0x2b   :  { %677 = vmatpush3.bf16.msra.mxu1 %v735_v42 }
  0x2c   :  { %659 = vmatpush3.bf16.msra.mxu0 %v728_v35  ;;  %678 = vmatprep.subr.bf16.mxu1 %v743_v32 }
  0x2d   :  { %660 = vmatprep.subr.bf16.mxu0 %v743_v32 }
  0x2f   :  { %679 = vmatpush3.bf16.msra.mxu1 %v736_v43 }
  0x30   :  { %661 = vmatpush3.bf16.msra.mxu0 %v729_v36  ;;  %680 = vmatprep.subr.bf16.mxu1 %v743_v32 }
  0x31   :  { %662 = vmatprep.subr.bf16.mxu0 %v743_v32 }
  0x33   :  { %681 = vmatpush3.bf16.msra.mxu1 %v737_v44 }
  0x34   :  { %663 = vmatpush3.bf16.msra.mxu0 %v730_v37  ;;  %682 = vmatprep.subr.bf16.mxu1 %v743_v32 }
  0x35   :  { %664 = vmatprep.subr.bf16.mxu0 %v743_v32 }
  0x37   :  { %683 = vmatpush3.bf16.msra.mxu1 %v738_v45 }
  0x38   :  { %665 = vmatpush3.bf16.msra.mxu0 %v731_v38  ;;  %684 = vmatprep.subr.bf16.mxu1 %v743_v32 }
  0x39   :  { %666 = vmatprep.subr.bf16.mxu0 %v743_v32 }
  0x3b   :  { %685 = vmatpush3.bf16.msra.mxu1 %v739_v46 }
  0x3c   :  { %667 = vmatpush3.bf16.msra.mxu0 %v732_v39  ;;  %686 = vmatprep.subr.bf16.mxu1 %v743_v32 }
  0x3d   :  { %668 = vmatprep.subr.bf16.mxu0 %v743_v32 }
  0x3f   :  { %687 = vmatpush3.bf16.msra.mxu1 %v740_v61 }
  0x40   :  { %669 = vmatpush3.bf16.msra.mxu0 %v733_v40  ;;  %688 = vmatprep.subr.bf16.mxu1 %v743_v32 }
  0x43   :  { %689 = vmatpush3.bf16.msra.mxu1 %v741_v62 }
  0xf6   :  { %v630_v47 = vpop.f32.mrb[0].mxu0 }
  0xf7   :  { %v631_v48 = vpop.f32.mrb[1].mxu0 }
  0xf8   :  { %v632_v50 = vadd.f32 %v631_v48, %v630_v47  ;;  %v633_v51 = vpop.f32.mrb[2].mxu0 }
  0xf9   :  { %v634_v52 = vpop.f32.mrb[3].mxu0  ;;  %v327_v53 = vpop.f32.mrb[0].mxu1 }
  0xfa   :  { %v288_v54 = vadd.f32 %v632_v50, %v565_v49  ;;  %v329_v55 = vpop.f32.mrb[1].mxu1 }
  0xfb   :  { %v330_v56 = vpop.f32.mrb[2].mxu1 }
  0xfc   :  { %v328_v57 = vadd.f32 %v327_v53, %v288_v54  ;;  %v331_v58 = vpop.f32.mrb[3].mxu1 }
  0xfe   :  { %v333_v59 = vmax.f32 %v328_v57, 0.0 }
 0x100   :  { %v334_v60 = vpack.c.bf16 %v333_v59, %v333_v59 }
 0x102   :  { %671 = vmatmul.mubr.bf16.vlgmr.msra.gmra.mrb[4].mxu0 %v334_v60 }
 0x1d5   :  { %v440_v0 = vpop.f32.mrb[4].mxu0 }
 0x1d6   :  { %v441_v1 = vadd.f32 %v596_v63, %v440_v0  ;;  %v672_v2 = vpop.f32.mrb[5].mxu0 }
 0x1d7   :  { %v443_v3 = vpop.f32.mrb[6].mxu0 }
 0x1d8   :  { %v446_v4 = vmax.f32 %v441_v1, 0.0  ;;  %v673_v5 = vpop.f32.mrb[7].mxu0 }
 0x1da   :  { %v447_v6 = vpack.c.bf16 %v446_v4, %v446_v4 }
 0x1dc   :  { %691 = vmatmul.mubr.bf16.vlgmr.msra.gmra.mrb[4].mxu1 %v447_v6 }
 0x2af   :  { %v553_v8 = vpop.f32.mrb[4].mxu1 }
 0x2b0   :  { %v554_v9 = vadd.f32 %v605_v7, %v553_v8  ;;  %v692_v10 = vpop.f32.mrb[5].mxu1 }
 0x2b1   :  { %v556_v11 = vpop.f32.mrb[6].mxu1 }
 0x2b2   :  { %560 = vst.msk [vmem:[%s960_s7] sm:$0xff] %vm559_vm2, %v554_v9  ;;  %v693_v12 = vpop.f32.mrb[7].mxu1 }

</bundles_post_ra>
